<compile_context>
chip_gen: v7x
topology: tpu7x:2x2x1
jax: 0.10.0
libtpu: 0.0.40
codegen_flags: <defaults>
</compile_context>

<pallas_src>
import functools

import jax
import jax.numpy as jnp
from jax.experimental import pallas as pl
from jax.experimental.pallas import tpu as pltpu


# --------------------------------------------------------------------------- #
# Fused text-encoder kernel (one grid step == one prompt, all layers)
# --------------------------------------------------------------------------- #
def _text_encoder_kernel(eot_ref, emb_ref, pos_ref, *refs, num_layers, num_heads):
    n_lw = 12 * num_layers
    layer_refs = refs[:n_lw]
    ln_f_g_ref = refs[n_lw]
    ln_f_b_ref = refs[n_lw + 1]
    tproj_ref = refs[n_lw + 2]
    o_ref = refs[n_lw + 3]

    S, D = emb_ref.shape[1], emb_ref.shape[2]
    H = num_heads
    Dh = D // H
    scale = 1.0 / (Dh ** 0.5)

    # Causal mask built in-kernel (no (S, S) f32 mask DMA input).
    row = jax.lax.broadcasted_iota(jnp.int32, (S, S), 0)
    col = jax.lax.broadcasted_iota(jnp.int32, (S, S), 1)
    causal = jnp.where(col > row, jnp.float32(-1e9), jnp.float32(0.0))

    def layer_norm(v, g_ref, b_ref):                     # f32 elementwise math
        mu = jnp.mean(v, axis=-1, keepdims=True)
        var = jnp.mean(jnp.square(v - mu), axis=-1, keepdims=True)
        vhat = (v - mu) * jax.lax.rsqrt(var + 1e-5)      # torch LayerNorm eps=1e-5
        return vhat * g_ref[...].astype(jnp.float32) + b_ref[...].astype(jnp.float32)

    # Residual stream kept in f32; MXU operands are bf16 (f32 accumulation).
    x = emb_ref[0].astype(jnp.float32) + pos_ref[...].astype(jnp.float32)   # (S, D)

    for l in range(num_layers):
        (ln1_g, ln1_b, w_qkv, b_qkv, w_out, b_out,
         ln2_g, ln2_b, w_fc, b_fc, w_proj, b_proj) = layer_refs[12 * l:12 * (l + 1)]

        # ---- attention sub-block: x = x + out_proj(MHA(ln_1(x))) ----
        h = layer_norm(x, ln1_g, ln1_b).astype(jnp.bfloat16)
        qkv = (jnp.dot(h, w_qkv[...], preferred_element_type=jnp.float32)
               + b_qkv[...].astype(jnp.float32))                       # (S, 3D) f32

        head_outs = []
        for hd in range(H):                                            # static loop
            qh = qkv[:, hd * Dh:(hd + 1) * Dh].astype(jnp.bfloat16)
            kh = qkv[:, D + hd * Dh:D + (hd + 1) * Dh].astype(jnp.bfloat16)
            vh = qkv[:, 2 * D + hd * Dh:2 * D + (hd + 1) * Dh].astype(jnp.bfloat16)
            s = jax.lax.dot_general(
                qh, kh, (((1,), (1,)), ((), ())),
                preferred_element_type=jnp.float32) * scale + causal   # (S, S) f32
            s = s - jnp.max(s, axis=-1, keepdims=True)
            e = jnp.exp(s)
            p = e * pl.reciprocal(jnp.sum(e, axis=-1, keepdims=True), approx=True)
            head_outs.append(
                jnp.dot(p.astype(jnp.bfloat16), vh,
                        preferred_element_type=jnp.float32))           # (S, Dh)
        a = jnp.concatenate(head_outs, axis=-1).astype(jnp.bfloat16)   # (S, D)
        x = x + (jnp.dot(a, w_out[...], preferred_element_type=jnp.float32)
                 + b_out[...].astype(jnp.float32))

        # ---- MLP sub-block: x = x + proj(QuickGELU(fc(ln_2(x)))) ----
        h = layer_norm(x, ln2_g, ln2_b).astype(jnp.bfloat16)
        f = (jnp.dot(h, w_fc[...], preferred_element_type=jnp.float32)
             + b_fc[...].astype(jnp.float32))
        f = f * jax.nn.sigmoid(1.702 * f)                              # QuickGELU (f32)
        x = x + (jnp.dot(f.astype(jnp.bfloat16), w_proj[...],
                         preferred_element_type=jnp.float32)
                 + b_proj[...].astype(jnp.float32))

    x = layer_norm(x, ln_f_g_ref, ln_f_b_ref)                          # (S, D) f32

    # x[eot] gather via one-hot reduction (avoids dynamic sublane slicing).
    eot = eot_ref[0]
    onehot = (jax.lax.broadcasted_iota(jnp.int32, (S, 1), 0) == eot
              ).astype(jnp.float32)                                    # (S, 1)
    x_eot = jnp.sum(x * onehot, axis=0, keepdims=True)                 # (1, D)
    o_ref[0] = jnp.dot(x_eot.astype(jnp.bfloat16), tproj_ref[...],
                       preferred_element_type=jnp.float32).astype(o_ref.dtype)


_LAYER_PARAM_ORDER = ("ln_1_g", "ln_1_b", "w_qkv", "b_qkv", "w_out", "b_out",
                      "ln_2_g", "ln_2_b", "w_fc", "b_fc", "w_proj", "b_proj")


def text_encoder(prompts_emb, tokenized_prompts, params, num_heads):
    """TextEncoder.forward fused into one pallas_call: returns (P, embed_dim)."""
    P, S, D = prompts_emb.shape
    E = params["text_projection"].shape[1]
    L = len(params["layers"])

    # argmax(dim=-1) of the tokenized prompt picks the EOT position (single
    # tokenized prompt broadcasts over all P embedded prompts, as in torch).
    eot = jnp.argmax(tokenized_prompts, axis=-1).astype(jnp.int32).reshape(1)

    def full_spec(a):
        nd = a.ndim
        return pl.BlockSpec(a.shape, lambda p, e, nd=nd: (0,) * nd)

    inputs = [prompts_emb, params["pos_emb"]]
    in_specs = [pl.BlockSpec((1, S, D), lambda p, e: (p, 0, 0)),
                full_spec(params["pos_emb"])]
    for lp in params["layers"]:
        for name in _LAYER_PARAM_ORDER:
            a = lp[name]
            if a.ndim == 1:
                a = a.reshape(1, -1)
            inputs.append(a)
            in_specs.append(full_spec(a))
    for name in ("ln_f_g", "ln_f_b"):
        a = params[name].reshape(1, -1)
        inputs.append(a)
        in_specs.append(full_spec(a))
    inputs.append(params["text_projection"])
    in_specs.append(full_spec(params["text_projection"]))

    kernel = functools.partial(_text_encoder_kernel,
                               num_layers=L, num_heads=num_heads)
    out = pl.pallas_call(
        kernel,
        grid_spec=pltpu.PrefetchScalarGridSpec(
            num_scalar_prefetch=1,                       # eot index -> SMEM
            grid=(P,),
            in_specs=in_specs,
            out_specs=pl.BlockSpec((1, 1, E), lambda p, e: (p, 0, 0)),
        ),
        out_shape=jax.ShapeDtypeStruct((P, 1, E), jnp.float32),
        compiler_params=pltpu.CompilerParams(
            dimension_semantics=("parallel",)),
    )(eot, *inputs)
    return out.reshape(P, E)


# --------------------------------------------------------------------------- #
# Similarity + softmax score kernel
# --------------------------------------------------------------------------- #
def _clip_score_kernel(img_ref, txt_ref, o_ref, *, flag):
    txt = txt_ref[...].astype(jnp.float32)                       # (P, D)
    # Reference normalises ONLY the text features (torch.norm(text_features)).
    inv_nor = jax.lax.rsqrt(jnp.sum(txt * txt, axis=-1, keepdims=True))
    txt_n = (txt * inv_nor).astype(jnp.bfloat16)
    sim = 100.0 * jax.lax.dot_general(                           # (M, P) f32
        img_ref[...].astype(jnp.bfloat16), txt_n,
        (((1,), (1,)), ((), ())), preferred_element_type=jnp.float32)
    if flag == 0:
        o_ref[...] = sim.astype(o_ref.dtype)
    else:
        sim = sim - jnp.max(sim, axis=-1, keepdims=True)
        e = jnp.exp(sim)
        p0 = e[:, 0:1] * pl.reciprocal(jnp.sum(e, axis=-1, keepdims=True),
                                       approx=True)              # (M, 1)
        # lane-dense (M, 128) store; wrapper slices column 0.
        o_ref[...] = jnp.broadcast_to(p0, o_ref.shape).astype(o_ref.dtype)


def clip_score(image_features, text_features, flag=1):
    """image_features: (M, D), text_features: (P, D)."""
    M, D = image_features.shape
    P = text_features.shape[0]
    out_cols = P if flag == 0 else 128
    out = pl.pallas_call(
        functools.partial(_clip_score_kernel, flag=flag),
        grid=(1,),
        in_specs=[pl.BlockSpec((M, D), lambda i: (0, 0)),
                  pl.BlockSpec((P, D), lambda i: (0, 0))],
        out_specs=pl.BlockSpec((M, out_cols), lambda i: (0, 0)),
        out_shape=jax.ShapeDtypeStruct((M, out_cols), jnp.float32),
    )(image_features, text_features)
    return out if flag == 0 else out[:, 0]


# --------------------------------------------------------------------------- #
# Prompts.forward
# --------------------------------------------------------------------------- #
def prompts_forward(tensor, embedding_prompt, tokenized_prompts, params,
                    num_heads, flag=1):
    """Prompts.forward: tensor (B, K, embed_dim) -> probs (B*K,) for flag=1."""
    text_features = text_encoder(embedding_prompt, tokenized_prompts, params,
                                 num_heads)
    B, K, D = tensor.shape
    image_features = tensor.reshape(B * K, D)   # per-i matmul + concat == flat matmul
    return clip_score(image_features, text_features, flag=flag)


# --------------------------------------------------------------------------- #
# Deterministic synthetic parameters (no checkpoint loading)
# --------------------------------------------------------------------------- #
def init_params(key, num_layers, width, embed_dim, context_length):
    keys = jax.random.split(key, 2 + num_layers)

    def nrm(k, shape, scale=0.02, dtype=jnp.bfloat16):
        return (scale * jax.random.normal(k, shape)).astype(dtype)

    params = {
        "pos_emb": nrm(keys[0], (context_length, width), dtype=jnp.float32),
        "ln_f_g": jnp.ones((width,), jnp.float32),
        "ln_f_b": jnp.zeros((width,), jnp.float32),
        # matmul weights stored bf16 (MXU operands); LN/bias params in f32.
        "text_projection": nrm(keys[1], (width, embed_dim), width ** -0.5),
        "layers": [],
    }
    for l in range(num_layers):
        lk = jax.random.split(keys[2 + l], 4)
        params["layers"].append({
            "ln_1_g": jnp.ones((width,), jnp.float32),
            "ln_1_b": jnp.zeros((width,), jnp.float32),
            "ln_2_g": jnp.ones((width,), jnp.float32),
            "ln_2_b": jnp.zeros((width,), jnp.float32),
            "w_qkv": nrm(lk[0], (width, 3 * width)),
            "b_qkv": jnp.zeros((3 * width,), jnp.float32),
            "w_out": nrm(lk[1], (width, width)),
            "b_out": jnp.zeros((width,), jnp.float32),
            "w_fc": nrm(lk[2], (width, 4 * width)),
            "b_fc": jnp.zeros((4 * width,), jnp.float32),
            "w_proj": nrm(lk[3], (4 * width, width)),
            "b_proj": jnp.zeros((width,), jnp.float32),
        })
    return params


if __name__ == "__main__":
    # Small synthetic CLIP text tower sizes.
    CONTEXT = 16          # context length (77 in real CLIP)
    WIDTH = 32            # transformer width
    HEADS = 4
    LAYERS = 2
    EMBED = 32            # text projection dim == image feature dim
    N_PROMPTS = 2         # embedding_prompt holds 2 prompts
    LENGTH_PROMPT = 8     # number of 'X' tokens
    B, K = 2, 8           # Prompts.forward input: tensor (B, K, EMBED)

    key = jax.random.PRNGKey(0)
    k_par, k_emb, k_img = jax.random.split(key, 3)

    params = init_params(k_par, LAYERS, WIDTH, EMBED, CONTEXT)

    # nn.Parameter(model.token_embedding(text)) stand-in (deterministic init).
    embedding_prompt = (0.02 * jax.random.normal(
        k_emb, (N_PROMPTS, CONTEXT, WIDTH))).astype(jnp.float32)

    # clip.tokenize(' '.join(['X'] * length_prompt)): SOT, X..., EOT (EOT id is the
    # max token id, so argmax(dim=-1) picks its position).
    # TODO(synk): real clip.tokenize BPE is not reproduced; only argmax semantics matter.
    tokenized_prompts = jnp.zeros((1, CONTEXT), jnp.int32)
    tokenized_prompts = tokenized_prompts.at[0, 0].set(49406)
    tokenized_prompts = tokenized_prompts.at[0, 1:1 + LENGTH_PROMPT].set(343)
    tokenized_prompts = tokenized_prompts.at[0, 1 + LENGTH_PROMPT].set(49407)

    tensor = jax.random.normal(k_img, (B, K, EMBED)).astype(jnp.float32)

    probs = prompts_forward(tensor, embedding_prompt, tokenized_prompts,
                            params, HEADS, flag=1)
    probs = jax.block_until_ready(probs)
    assert probs.shape == (B * K,)
    assert bool(jnp.all(jnp.isfinite(probs)))
    print("KERNEL_OK")
</pallas_src>

<mosaic_0001>
module attributes {stable_mosaic.version = 11 : i64} {
  func.func @_text_encoder_kernel(%arg0: i32, %arg1: memref<1xi32, #tpu.memory_space<smem>>, %arg2: memref<1x16x32xf32, #tpu.memory_space<vmem>>, %arg3: memref<16x32xf32, #tpu.memory_space<vmem>>, %arg4: memref<1x32xf32, #tpu.memory_space<vmem>>, %arg5: memref<1x32xf32, #tpu.memory_space<vmem>>, %arg6: memref<32x96xbf16, #tpu.memory_space<vmem>>, %arg7: memref<1x96xf32, #tpu.memory_space<vmem>>, %arg8: memref<32x32xbf16, #tpu.memory_space<vmem>>, %arg9: memref<1x32xf32, #tpu.memory_space<vmem>>, %arg10: memref<1x32xf32, #tpu.memory_space<vmem>>, %arg11: memref<1x32xf32, #tpu.memory_space<vmem>>, %arg12: memref<32x128xbf16, #tpu.memory_space<vmem>>, %arg13: memref<1x128xf32, #tpu.memory_space<vmem>>, %arg14: memref<128x32xbf16, #tpu.memory_space<vmem>>, %arg15: memref<1x32xf32, #tpu.memory_space<vmem>>, %arg16: memref<1x32xf32, #tpu.memory_space<vmem>>, %arg17: memref<1x32xf32, #tpu.memory_space<vmem>>, %arg18: memref<32x96xbf16, #tpu.memory_space<vmem>>, %arg19: memref<1x96xf32, #tpu.memory_space<vmem>>, %arg20: memref<32x32xbf16, #tpu.memory_space<vmem>>, %arg21: memref<1x32xf32, #tpu.memory_space<vmem>>, %arg22: memref<1x32xf32, #tpu.memory_space<vmem>>, %arg23: memref<1x32xf32, #tpu.memory_space<vmem>>, %arg24: memref<32x128xbf16, #tpu.memory_space<vmem>>, %arg25: memref<1x128xf32, #tpu.memory_space<vmem>>, %arg26: memref<128x32xbf16, #tpu.memory_space<vmem>>, %arg27: memref<1x32xf32, #tpu.memory_space<vmem>>, %arg28: memref<1x32xf32, #tpu.memory_space<vmem>>, %arg29: memref<1x32xf32, #tpu.memory_space<vmem>>, %arg30: memref<32x32xbf16, #tpu.memory_space<vmem>>, %arg31: memref<1x1x32xf32, #tpu.memory_space<vmem>>) attributes {dimension_semantics = [#tpu.dimension_semantics<parallel>], iteration_bounds = array<i64: 2>, scalar_prefetch = 1 : i64, scratch_operands = 0 : i64, tpu.core_type = #tpu.core_type<tc>, window_params = [{transform_indices = @transform_0, window_bounds = array<i64: 1, 16, 32>}, {pipeline_mode = #tpu.pipeline_mode<synchronous>, transform_indices = @transform_1, window_bounds = array<i64: 16, 32>}, {pipeline_mode = #tpu.pipeline_mode<synchronous>, transform_indices = @transform_2, window_bounds = array<i64: 1, 32>}, {pipeline_mode = #tpu.pipeline_mode<synchronous>, transform_indices = @transform_3, window_bounds = array<i64: 1, 32>}, {pipeline_mode = #tpu.pipeline_mode<synchronous>, transform_indices = @transform_4, window_bounds = array<i64: 32, 96>}, {pipeline_mode = #tpu.pipeline_mode<synchronous>, transform_indices = @transform_5, window_bounds = array<i64: 1, 96>}, {pipeline_mode = #tpu.pipeline_mode<synchronous>, transform_indices = @transform_6, window_bounds = array<i64: 32, 32>}, {pipeline_mode = #tpu.pipeline_mode<synchronous>, transform_indices = @transform_7, window_bounds = array<i64: 1, 32>}, {pipeline_mode = #tpu.pipeline_mode<synchronous>, transform_indices = @transform_8, window_bounds = array<i64: 1, 32>}, {pipeline_mode = #tpu.pipeline_mode<synchronous>, transform_indices = @transform_9, window_bounds = array<i64: 1, 32>}, {pipeline_mode = #tpu.pipeline_mode<synchronous>, transform_indices = @transform_10, window_bounds = array<i64: 32, 128>}, {pipeline_mode = #tpu.pipeline_mode<synchronous>, transform_indices = @transform_11, window_bounds = array<i64: 1, 128>}, {pipeline_mode = #tpu.pipeline_mode<synchronous>, transform_indices = @transform_12, window_bounds = array<i64: 128, 32>}, {pipeline_mode = #tpu.pipeline_mode<synchronous>, transform_indices = @transform_13, window_bounds = array<i64: 1, 32>}, {pipeline_mode = #tpu.pipeline_mode<synchronous>, transform_indices = @transform_14, window_bounds = array<i64: 1, 32>}, {pipeline_mode = #tpu.pipeline_mode<synchronous>, transform_indices = @transform_15, window_bounds = array<i64: 1, 32>}, {pipeline_mode = #tpu.pipeline_mode<synchronous>, transform_indices = @transform_16, window_bounds = array<i64: 32, 96>}, {pipeline_mode = #tpu.pipeline_mode<synchronous>, transform_indices = @transform_17, window_bounds = array<i64: 1, 96>}, {pipeline_mode = #tpu.pipeline_mode<synchronous>, transform_indices = @transform_18, window_bounds = array<i64: 32, 32>}, {pipeline_mode = #tpu.pipeline_mode<synchronous>, transform_indices = @transform_19, window_bounds = array<i64: 1, 32>}, {pipeline_mode = #tpu.pipeline_mode<synchronous>, transform_indices = @transform_20, window_bounds = array<i64: 1, 32>}, {pipeline_mode = #tpu.pipeline_mode<synchronous>, transform_indices = @transform_21, window_bounds = array<i64: 1, 32>}, {pipeline_mode = #tpu.pipeline_mode<synchronous>, transform_indices = @transform_22, window_bounds = array<i64: 32, 128>}, {pipeline_mode = #tpu.pipeline_mode<synchronous>, transform_indices = @transform_23, window_bounds = array<i64: 1, 128>}, {pipeline_mode = #tpu.pipeline_mode<synchronous>, transform_indices = @transform_24, window_bounds = array<i64: 128, 32>}, {pipeline_mode = #tpu.pipeline_mode<synchronous>, transform_indices = @transform_25, window_bounds = array<i64: 1, 32>}, {pipeline_mode = #tpu.pipeline_mode<synchronous>, transform_indices = @transform_26, window_bounds = array<i64: 1, 32>}, {pipeline_mode = #tpu.pipeline_mode<synchronous>, transform_indices = @transform_27, window_bounds = array<i64: 1, 32>}, {pipeline_mode = #tpu.pipeline_mode<synchronous>, transform_indices = @transform_28, window_bounds = array<i64: 32, 32>}, {transform_indices = @transform_29, window_bounds = array<i64: 1, 1, 32>}]} {
    %0 = tpu.iota {dimensions = array<i32: 0>} : vector<16x16xi32>
    %1 = tpu.iota {dimensions = array<i32: 1>} : vector<16x16xi32>
    %2 = arith.cmpi sgt, %1, %0 : vector<16x16xi32>
    %cst = arith.constant -1.000000e+09 : f32
    %cst_0 = arith.constant 0.000000e+00 : f32
    %3 = vector.broadcast %cst : f32 to vector<16x16xf32>
    %4 = vector.broadcast %cst_0 : f32 to vector<16x16xf32>
    %5 = arith.select %2, %3, %4 : vector<16x16xi1>, vector<16x16xf32>
    %c0 = arith.constant 0 : index
    %c0_1 = arith.constant 0 : index
    %c0_2 = arith.constant 0 : index
    %6 = vector.load %arg2[%c0, %c0_1, %c0_2] : memref<1x16x32xf32, #tpu.memory_space<vmem>>, vector<1x16x32xf32>
    %7 = vector.shape_cast %6 : vector<1x16x32xf32> to vector<16x32xf32>
    %c0_3 = arith.constant 0 : index
    %c0_4 = arith.constant 0 : index
    %8 = vector.load %arg3[%c0_3, %c0_4] : memref<16x32xf32, #tpu.memory_space<vmem>>, vector<16x32xf32>
    %9 = arith.addf %7, %8 : vector<16x32xf32>
    %cst_5 = arith.constant dense<0.000000e+00> : vector<16xf32>
    %10 = vector.multi_reduction <add>, %9, %cst_5 [1] : vector<16x32xf32> to vector<16xf32>
    %11 = vector.shape_cast %10 : vector<16xf32> to vector<16x1xf32>
    %cst_6 = arith.constant 3.200000e+01 : f32
    %12 = vector.broadcast %cst_6 : f32 to vector<16x1xf32>
    %13 = arith.divf %11, %12 : vector<16x1xf32>
    %14 = vector.broadcast %13 : vector<16x1xf32> to vector<16x32xf32>
    %15 = arith.subf %9, %14 : vector<16x32xf32>
    %16 = arith.mulf %15, %15 : vector<16x32xf32>
    %cst_7 = arith.constant dense<0.000000e+00> : vector<16xf32>
    %17 = vector.multi_reduction <add>, %16, %cst_7 [1] : vector<16x32xf32> to vector<16xf32>
    %18 = vector.shape_cast %17 : vector<16xf32> to vector<16x1xf32>
    %cst_8 = arith.constant 3.200000e+01 : f32
    %19 = vector.broadcast %cst_8 : f32 to vector<16x1xf32>
    %20 = arith.divf %18, %19 : vector<16x1xf32>
    %21 = vector.broadcast %13 : vector<16x1xf32> to vector<16x32xf32>
    %22 = arith.subf %9, %21 : vector<16x32xf32>
    %cst_9 = arith.constant 9.99999974E-6 : f32
    %23 = vector.broadcast %cst_9 : f32 to vector<16x1xf32>
    %24 = arith.addf %20, %23 : vector<16x1xf32>
    %25 = math.rsqrt %24 : vector<16x1xf32>
    %26 = vector.broadcast %25 : vector<16x1xf32> to vector<16x32xf32>
    %27 = arith.mulf %22, %26 : vector<16x32xf32>
    %c0_10 = arith.constant 0 : index
    %c0_11 = arith.constant 0 : index
    %28 = vector.load %arg4[%c0_10, %c0_11] : memref<1x32xf32, #tpu.memory_space<vmem>>, vector<1x32xf32>
    %29 = vector.broadcast %28 : vector<1x32xf32> to vector<16x32xf32>
    %30 = arith.mulf %27, %29 : vector<16x32xf32>
    %c0_12 = arith.constant 0 : index
    %c0_13 = arith.constant 0 : index
    %31 = vector.load %arg5[%c0_12, %c0_13] : memref<1x32xf32, #tpu.memory_space<vmem>>, vector<1x32xf32>
    %32 = vector.broadcast %31 : vector<1x32xf32> to vector<16x32xf32>
    %33 = arith.addf %30, %32 : vector<16x32xf32>
    %34 = arith.truncf %33 : vector<16x32xf32> to vector<16x32xbf16>
    %c0_14 = arith.constant 0 : index
    %c0_15 = arith.constant 0 : index
    %35 = vector.load %arg6[%c0_14, %c0_15] : memref<32x96xbf16, #tpu.memory_space<vmem>>, vector<32x96xbf16>
    %cst_16 = arith.constant dense<0.000000e+00> : vector<16x96xf32>
    %36 = tpu.matmul %34, %35, %cst_16 {dimension_numbers = #tpu.dot_dimension_numbers<[1], [0], [0], [1], [0, 0, 1, 1], [], []>} : vector<16x32xbf16>, vector<32x96xbf16>, vector<16x96xf32> -> vector<16x96xf32>
    %c0_17 = arith.constant 0 : index
    %c0_18 = arith.constant 0 : index
    %37 = vector.load %arg7[%c0_17, %c0_18] : memref<1x96xf32, #tpu.memory_space<vmem>>, vector<1x96xf32>
    %38 = vector.broadcast %37 : vector<1x96xf32> to vector<16x96xf32>
    %39 = arith.addf %36, %38 : vector<16x96xf32>
    %40 = vector.extract_strided_slice %39 {offsets = [0, 0], sizes = [16, 8], strides = [1, 1]} : vector<16x96xf32> to vector<16x8xf32>
    %41 = arith.truncf %40 : vector<16x8xf32> to vector<16x8xbf16>
    %42 = vector.extract_strided_slice %39 {offsets = [0, 32], sizes = [16, 8], strides = [1, 1]} : vector<16x96xf32> to vector<16x8xf32>
    %43 = arith.truncf %42 : vector<16x8xf32> to vector<16x8xbf16>
    %44 = vector.extract_strided_slice %39 {offsets = [0, 64], sizes = [16, 8], strides = [1, 1]} : vector<16x96xf32> to vector<16x8xf32>
    %45 = arith.truncf %44 : vector<16x8xf32> to vector<16x8xbf16>
    %cst_19 = arith.constant dense<0.000000e+00> : vector<16x16xf32>
    %46 = tpu.matmul %41, %43, %cst_19 {dimension_numbers = #tpu.dot_dimension_numbers<[1], [1], [0], [0], [0, 0, 1, 0], [], []>} : vector<16x8xbf16>, vector<16x8xbf16>, vector<16x16xf32> -> vector<16x16xf32>
    %cst_20 = arith.constant 0.353553385 : f32
    %47 = vector.broadcast %cst_20 : f32 to vector<16x16xf32>
    %48 = arith.mulf %46, %47 : vector<16x16xf32>
    %49 = arith.addf %48, %5 : vector<16x16xf32>
    %cst_21 = arith.constant dense<0xFF800000> : vector<16xf32>
    %50 = vector.multi_reduction <maximumf>, %49, %cst_21 [1] : vector<16x16xf32> to vector<16xf32>
    %51 = vector.shape_cast %50 : vector<16xf32> to vector<16x1xf32>
    %52 = vector.broadcast %51 : vector<16x1xf32> to vector<16x16xf32>
    %53 = arith.subf %49, %52 : vector<16x16xf32>
    %54 = math.exp %53 : vector<16x16xf32>
    %cst_22 = arith.constant dense<0.000000e+00> : vector<16xf32>
    %55 = vector.multi_reduction <add>, %54, %cst_22 [1] : vector<16x16xf32> to vector<16xf32>
    %56 = vector.shape_cast %55 : vector<16xf32> to vector<16x1xf32>
    %57 = tpu.reciprocal %56 {approx = true} : vector<16x1xf32> -> vector<16x1xf32>
    %58 = vector.broadcast %57 : vector<16x1xf32> to vector<16x16xf32>
    %59 = arith.mulf %54, %58 : vector<16x16xf32>
    %60 = arith.truncf %59 : vector<16x16xf32> to vector<16x16xbf16>
    %cst_23 = arith.constant dense<0.000000e+00> : vector<16x8xf32>
    %61 = tpu.matmul %60, %45, %cst_23 {dimension_numbers = #tpu.dot_dimension_numbers<[1], [0], [0], [1], [0, 0, 1, 1], [], []>} : vector<16x16xbf16>, vector<16x8xbf16>, vector<16x8xf32> -> vector<16x8xf32>
    %62 = vector.extract_strided_slice %39 {offsets = [0, 8], sizes = [16, 8], strides = [1, 1]} : vector<16x96xf32> to vector<16x8xf32>
    %63 = arith.truncf %62 : vector<16x8xf32> to vector<16x8xbf16>
    %64 = vector.extract_strided_slice %39 {offsets = [0, 40], sizes = [16, 8], strides = [1, 1]} : vector<16x96xf32> to vector<16x8xf32>
    %65 = arith.truncf %64 : vector<16x8xf32> to vector<16x8xbf16>
    %66 = vector.extract_strided_slice %39 {offsets = [0, 72], sizes = [16, 8], strides = [1, 1]} : vector<16x96xf32> to vector<16x8xf32>
    %67 = arith.truncf %66 : vector<16x8xf32> to vector<16x8xbf16>
    %cst_24 = arith.constant dense<0.000000e+00> : vector<16x16xf32>
    %68 = tpu.matmul %63, %65, %cst_24 {dimension_numbers = #tpu.dot_dimension_numbers<[1], [1], [0], [0], [0, 0, 1, 0], [], []>} : vector<16x8xbf16>, vector<16x8xbf16>, vector<16x16xf32> -> vector<16x16xf32>
    %cst_25 = arith.constant 0.353553385 : f32
    %69 = vector.broadcast %cst_25 : f32 to vector<16x16xf32>
    %70 = arith.mulf %68, %69 : vector<16x16xf32>
    %71 = arith.addf %70, %5 : vector<16x16xf32>
    %cst_26 = arith.constant dense<0xFF800000> : vector<16xf32>
    %72 = vector.multi_reduction <maximumf>, %71, %cst_26 [1] : vector<16x16xf32> to vector<16xf32>
    %73 = vector.shape_cast %72 : vector<16xf32> to vector<16x1xf32>
    %74 = vector.broadcast %73 : vector<16x1xf32> to vector<16x16xf32>
    %75 = arith.subf %71, %74 : vector<16x16xf32>
    %76 = math.exp %75 : vector<16x16xf32>
    %cst_27 = arith.constant dense<0.000000e+00> : vector<16xf32>
    %77 = vector.multi_reduction <add>, %76, %cst_27 [1] : vector<16x16xf32> to vector<16xf32>
    %78 = vector.shape_cast %77 : vector<16xf32> to vector<16x1xf32>
    %79 = tpu.reciprocal %78 {approx = true} : vector<16x1xf32> -> vector<16x1xf32>
    %80 = vector.broadcast %79 : vector<16x1xf32> to vector<16x16xf32>
    %81 = arith.mulf %76, %80 : vector<16x16xf32>
    %82 = arith.truncf %81 : vector<16x16xf32> to vector<16x16xbf16>
    %cst_28 = arith.constant dense<0.000000e+00> : vector<16x8xf32>
    %83 = tpu.matmul %82, %67, %cst_28 {dimension_numbers = #tpu.dot_dimension_numbers<[1], [0], [0], [1], [0, 0, 1, 1], [], []>} : vector<16x16xbf16>, vector<16x8xbf16>, vector<16x8xf32> -> vector<16x8xf32>
    %84 = vector.extract_strided_slice %39 {offsets = [0, 16], sizes = [16, 8], strides = [1, 1]} : vector<16x96xf32> to vector<16x8xf32>
    %85 = arith.truncf %84 : vector<16x8xf32> to vector<16x8xbf16>
    %86 = vector.extract_strided_slice %39 {offsets = [0, 48], sizes = [16, 8], strides = [1, 1]} : vector<16x96xf32> to vector<16x8xf32>
    %87 = arith.truncf %86 : vector<16x8xf32> to vector<16x8xbf16>
    %88 = vector.extract_strided_slice %39 {offsets = [0, 80], sizes = [16, 8], strides = [1, 1]} : vector<16x96xf32> to vector<16x8xf32>
    %89 = arith.truncf %88 : vector<16x8xf32> to vector<16x8xbf16>
    %cst_29 = arith.constant dense<0.000000e+00> : vector<16x16xf32>
    %90 = tpu.matmul %85, %87, %cst_29 {dimension_numbers = #tpu.dot_dimension_numbers<[1], [1], [0], [0], [0, 0, 1, 0], [], []>} : vector<16x8xbf16>, vector<16x8xbf16>, vector<16x16xf32> -> vector<16x16xf32>
    %cst_30 = arith.constant 0.353553385 : f32
    %91 = vector.broadcast %cst_30 : f32 to vector<16x16xf32>
    %92 = arith.mulf %90, %91 : vector<16x16xf32>
    %93 = arith.addf %92, %5 : vector<16x16xf32>
    %cst_31 = arith.constant dense<0xFF800000> : vector<16xf32>
    %94 = vector.multi_reduction <maximumf>, %93, %cst_31 [1] : vector<16x16xf32> to vector<16xf32>
    %95 = vector.shape_cast %94 : vector<16xf32> to vector<16x1xf32>
    %96 = vector.broadcast %95 : vector<16x1xf32> to vector<16x16xf32>
    %97 = arith.subf %93, %96 : vector<16x16xf32>
    %98 = math.exp %97 : vector<16x16xf32>
    %cst_32 = arith.constant dense<0.000000e+00> : vector<16xf32>
    %99 = vector.multi_reduction <add>, %98, %cst_32 [1] : vector<16x16xf32> to vector<16xf32>
    %100 = vector.shape_cast %99 : vector<16xf32> to vector<16x1xf32>
    %101 = tpu.reciprocal %100 {approx = true} : vector<16x1xf32> -> vector<16x1xf32>
    %102 = vector.broadcast %101 : vector<16x1xf32> to vector<16x16xf32>
    %103 = arith.mulf %98, %102 : vector<16x16xf32>
    %104 = arith.truncf %103 : vector<16x16xf32> to vector<16x16xbf16>
    %cst_33 = arith.constant dense<0.000000e+00> : vector<16x8xf32>
    %105 = tpu.matmul %104, %89, %cst_33 {dimension_numbers = #tpu.dot_dimension_numbers<[1], [0], [0], [1], [0, 0, 1, 1], [], []>} : vector<16x16xbf16>, vector<16x8xbf16>, vector<16x8xf32> -> vector<16x8xf32>
    %106 = vector.extract_strided_slice %39 {offsets = [0, 24], sizes = [16, 8], strides = [1, 1]} : vector<16x96xf32> to vector<16x8xf32>
    %107 = arith.truncf %106 : vector<16x8xf32> to vector<16x8xbf16>
    %108 = vector.extract_strided_slice %39 {offsets = [0, 56], sizes = [16, 8], strides = [1, 1]} : vector<16x96xf32> to vector<16x8xf32>
    %109 = arith.truncf %108 : vector<16x8xf32> to vector<16x8xbf16>
    %110 = vector.extract_strided_slice %39 {offsets = [0, 88], sizes = [16, 8], strides = [1, 1]} : vector<16x96xf32> to vector<16x8xf32>
    %111 = arith.truncf %110 : vector<16x8xf32> to vector<16x8xbf16>
    %cst_34 = arith.constant dense<0.000000e+00> : vector<16x16xf32>
    %112 = tpu.matmul %107, %109, %cst_34 {dimension_numbers = #tpu.dot_dimension_numbers<[1], [1], [0], [0], [0, 0, 1, 0], [], []>} : vector<16x8xbf16>, vector<16x8xbf16>, vector<16x16xf32> -> vector<16x16xf32>
    %cst_35 = arith.constant 0.353553385 : f32
    %113 = vector.broadcast %cst_35 : f32 to vector<16x16xf32>
    %114 = arith.mulf %112, %113 : vector<16x16xf32>
    %115 = arith.addf %114, %5 : vector<16x16xf32>
    %cst_36 = arith.constant dense<0xFF800000> : vector<16xf32>
    %116 = vector.multi_reduction <maximumf>, %115, %cst_36 [1] : vector<16x16xf32> to vector<16xf32>
    %117 = vector.shape_cast %116 : vector<16xf32> to vector<16x1xf32>
    %118 = vector.broadcast %117 : vector<16x1xf32> to vector<16x16xf32>
    %119 = arith.subf %115, %118 : vector<16x16xf32>
    %120 = math.exp %119 : vector<16x16xf32>
    %cst_37 = arith.constant dense<0.000000e+00> : vector<16xf32>
    %121 = vector.multi_reduction <add>, %120, %cst_37 [1] : vector<16x16xf32> to vector<16xf32>
    %122 = vector.shape_cast %121 : vector<16xf32> to vector<16x1xf32>
    %123 = tpu.reciprocal %122 {approx = true} : vector<16x1xf32> -> vector<16x1xf32>
    %124 = vector.broadcast %123 : vector<16x1xf32> to vector<16x16xf32>
    %125 = arith.mulf %120, %124 : vector<16x16xf32>
    %126 = arith.truncf %125 : vector<16x16xf32> to vector<16x16xbf16>
    %cst_38 = arith.constant dense<0.000000e+00> : vector<16x8xf32>
    %127 = tpu.matmul %126, %111, %cst_38 {dimension_numbers = #tpu.dot_dimension_numbers<[1], [0], [0], [1], [0, 0, 1, 1], [], []>} : vector<16x16xbf16>, vector<16x8xbf16>, vector<16x8xf32> -> vector<16x8xf32>
    %128 = tpu.concatenate %61, %83, %105, %127 in 1 : vector<16x8xf32>, vector<16x8xf32>, vector<16x8xf32>, vector<16x8xf32> -> vector<16x32xf32>
    %129 = arith.truncf %128 : vector<16x32xf32> to vector<16x32xbf16>
    %c0_39 = arith.constant 0 : index
    %c0_40 = arith.constant 0 : index
    %130 = vector.load %arg8[%c0_39, %c0_40] : memref<32x32xbf16, #tpu.memory_space<vmem>>, vector<32x32xbf16>
    %cst_41 = arith.constant dense<0.000000e+00> : vector<16x32xf32>
    %131 = tpu.matmul %129, %130, %cst_41 {dimension_numbers = #tpu.dot_dimension_numbers<[1], [0], [0], [1], [0, 0, 1, 1], [], []>} : vector<16x32xbf16>, vector<32x32xbf16>, vector<16x32xf32> -> vector<16x32xf32>
    %c0_42 = arith.constant 0 : index
    %c0_43 = arith.constant 0 : index
    %132 = vector.load %arg9[%c0_42, %c0_43] : memref<1x32xf32, #tpu.memory_space<vmem>>, vector<1x32xf32>
    %133 = vector.broadcast %132 : vector<1x32xf32> to vector<16x32xf32>
    %134 = arith.addf %131, %133 : vector<16x32xf32>
    %135 = arith.addf %9, %134 : vector<16x32xf32>
    %cst_44 = arith.constant dense<0.000000e+00> : vector<16xf32>
    %136 = vector.multi_reduction <add>, %135, %cst_44 [1] : vector<16x32xf32> to vector<16xf32>
    %137 = vector.shape_cast %136 : vector<16xf32> to vector<16x1xf32>
    %cst_45 = arith.constant 3.200000e+01 : f32
    %138 = vector.broadcast %cst_45 : f32 to vector<16x1xf32>
    %139 = arith.divf %137, %138 : vector<16x1xf32>
    %140 = vector.broadcast %139 : vector<16x1xf32> to vector<16x32xf32>
    %141 = arith.subf %135, %140 : vector<16x32xf32>
    %142 = arith.mulf %141, %141 : vector<16x32xf32>
    %cst_46 = arith.constant dense<0.000000e+00> : vector<16xf32>
    %143 = vector.multi_reduction <add>, %142, %cst_46 [1] : vector<16x32xf32> to vector<16xf32>
    %144 = vector.shape_cast %143 : vector<16xf32> to vector<16x1xf32>
    %cst_47 = arith.constant 3.200000e+01 : f32
    %145 = vector.broadcast %cst_47 : f32 to vector<16x1xf32>
    %146 = arith.divf %144, %145 : vector<16x1xf32>
    %147 = vector.broadcast %139 : vector<16x1xf32> to vector<16x32xf32>
    %148 = arith.subf %135, %147 : vector<16x32xf32>
    %cst_48 = arith.constant 9.99999974E-6 : f32
    %149 = vector.broadcast %cst_48 : f32 to vector<16x1xf32>
    %150 = arith.addf %146, %149 : vector<16x1xf32>
    %151 = math.rsqrt %150 : vector<16x1xf32>
    %152 = vector.broadcast %151 : vector<16x1xf32> to vector<16x32xf32>
    %153 = arith.mulf %148, %152 : vector<16x32xf32>
    %c0_49 = arith.constant 0 : index
    %c0_50 = arith.constant 0 : index
    %154 = vector.load %arg10[%c0_49, %c0_50] : memref<1x32xf32, #tpu.memory_space<vmem>>, vector<1x32xf32>
    %155 = vector.broadcast %154 : vector<1x32xf32> to vector<16x32xf32>
    %156 = arith.mulf %153, %155 : vector<16x32xf32>
    %c0_51 = arith.constant 0 : index
    %c0_52 = arith.constant 0 : index
    %157 = vector.load %arg11[%c0_51, %c0_52] : memref<1x32xf32, #tpu.memory_space<vmem>>, vector<1x32xf32>
    %158 = vector.broadcast %157 : vector<1x32xf32> to vector<16x32xf32>
    %159 = arith.addf %156, %158 : vector<16x32xf32>
    %160 = arith.truncf %159 : vector<16x32xf32> to vector<16x32xbf16>
    %c0_53 = arith.constant 0 : index
    %c0_54 = arith.constant 0 : index
    %161 = vector.load %arg12[%c0_53, %c0_54] : memref<32x128xbf16, #tpu.memory_space<vmem>>, vector<32x128xbf16>
    %cst_55 = arith.constant dense<0.000000e+00> : vector<16x128xf32>
    %162 = tpu.matmul %160, %161, %cst_55 {dimension_numbers = #tpu.dot_dimension_numbers<[1], [0], [0], [1], [0, 0, 1, 1], [], []>} : vector<16x32xbf16>, vector<32x128xbf16>, vector<16x128xf32> -> vector<16x128xf32>
    %c0_56 = arith.constant 0 : index
    %c0_57 = arith.constant 0 : index
    %163 = vector.load %arg13[%c0_56, %c0_57] : memref<1x128xf32, #tpu.memory_space<vmem>>, vector<1x128xf32>
    %164 = vector.broadcast %163 : vector<1x128xf32> to vector<16x128xf32>
    %165 = arith.addf %162, %164 : vector<16x128xf32>
    %cst_58 = arith.constant 1.702000e+00 : f32
    %166 = vector.broadcast %cst_58 : f32 to vector<16x128xf32>
    %167 = arith.mulf %166, %165 : vector<16x128xf32>
    %168 = arith.negf %167 : vector<16x128xf32>
    %169 = math.exp %168 : vector<16x128xf32>
    %cst_59 = arith.constant 1.000000e+00 : f32
    %170 = vector.broadcast %cst_59 : f32 to vector<16x128xf32>
    %171 = arith.addf %170, %169 : vector<16x128xf32>
    %172 = arith.divf %170, %171 : vector<16x128xf32>
    %173 = arith.mulf %165, %172 : vector<16x128xf32>
    %174 = arith.truncf %173 : vector<16x128xf32> to vector<16x128xbf16>
    %c0_60 = arith.constant 0 : index
    %c0_61 = arith.constant 0 : index
    %175 = vector.load %arg14[%c0_60, %c0_61] : memref<128x32xbf16, #tpu.memory_space<vmem>>, vector<128x32xbf16>
    %cst_62 = arith.constant dense<0.000000e+00> : vector<16x32xf32>
    %176 = tpu.matmul %174, %175, %cst_62 {dimension_numbers = #tpu.dot_dimension_numbers<[1], [0], [0], [1], [0, 0, 1, 1], [], []>} : vector<16x128xbf16>, vector<128x32xbf16>, vector<16x32xf32> -> vector<16x32xf32>
    %c0_63 = arith.constant 0 : index
    %c0_64 = arith.constant 0 : index
    %177 = vector.load %arg15[%c0_63, %c0_64] : memref<1x32xf32, #tpu.memory_space<vmem>>, vector<1x32xf32>
    %178 = vector.broadcast %177 : vector<1x32xf32> to vector<16x32xf32>
    %179 = arith.addf %176, %178 : vector<16x32xf32>
    %180 = arith.addf %135, %179 : vector<16x32xf32>
    %cst_65 = arith.constant dense<0.000000e+00> : vector<16xf32>
    %181 = vector.multi_reduction <add>, %180, %cst_65 [1] : vector<16x32xf32> to vector<16xf32>
    %182 = vector.shape_cast %181 : vector<16xf32> to vector<16x1xf32>
    %cst_66 = arith.constant 3.200000e+01 : f32
    %183 = vector.broadcast %cst_66 : f32 to vector<16x1xf32>
    %184 = arith.divf %182, %183 : vector<16x1xf32>
    %185 = vector.broadcast %184 : vector<16x1xf32> to vector<16x32xf32>
    %186 = arith.subf %180, %185 : vector<16x32xf32>
    %187 = arith.mulf %186, %186 : vector<16x32xf32>
    %cst_67 = arith.constant dense<0.000000e+00> : vector<16xf32>
    %188 = vector.multi_reduction <add>, %187, %cst_67 [1] : vector<16x32xf32> to vector<16xf32>
    %189 = vector.shape_cast %188 : vector<16xf32> to vector<16x1xf32>
    %cst_68 = arith.constant 3.200000e+01 : f32
    %190 = vector.broadcast %cst_68 : f32 to vector<16x1xf32>
    %191 = arith.divf %189, %190 : vector<16x1xf32>
    %192 = vector.broadcast %184 : vector<16x1xf32> to vector<16x32xf32>
    %193 = arith.subf %180, %192 : vector<16x32xf32>
    %cst_69 = arith.constant 9.99999974E-6 : f32
    %194 = vector.broadcast %cst_69 : f32 to vector<16x1xf32>
    %195 = arith.addf %191, %194 : vector<16x1xf32>
    %196 = math.rsqrt %195 : vector<16x1xf32>
    %197 = vector.broadcast %196 : vector<16x1xf32> to vector<16x32xf32>
    %198 = arith.mulf %193, %197 : vector<16x32xf32>
    %c0_70 = arith.constant 0 : index
    %c0_71 = arith.constant 0 : index
    %199 = vector.load %arg16[%c0_70, %c0_71] : memref<1x32xf32, #tpu.memory_space<vmem>>, vector<1x32xf32>
    %200 = vector.broadcast %199 : vector<1x32xf32> to vector<16x32xf32>
    %201 = arith.mulf %198, %200 : vector<16x32xf32>
    %c0_72 = arith.constant 0 : index
    %c0_73 = arith.constant 0 : index
    %202 = vector.load %arg17[%c0_72, %c0_73] : memref<1x32xf32, #tpu.memory_space<vmem>>, vector<1x32xf32>
    %203 = vector.broadcast %202 : vector<1x32xf32> to vector<16x32xf32>
    %204 = arith.addf %201, %203 : vector<16x32xf32>
    %205 = arith.truncf %204 : vector<16x32xf32> to vector<16x32xbf16>
    %c0_74 = arith.constant 0 : index
    %c0_75 = arith.constant 0 : index
    %206 = vector.load %arg18[%c0_74, %c0_75] : memref<32x96xbf16, #tpu.memory_space<vmem>>, vector<32x96xbf16>
    %cst_76 = arith.constant dense<0.000000e+00> : vector<16x96xf32>
    %207 = tpu.matmul %205, %206, %cst_76 {dimension_numbers = #tpu.dot_dimension_numbers<[1], [0], [0], [1], [0, 0, 1, 1], [], []>} : vector<16x32xbf16>, vector<32x96xbf16>, vector<16x96xf32> -> vector<16x96xf32>
    %c0_77 = arith.constant 0 : index
    %c0_78 = arith.constant 0 : index
    %208 = vector.load %arg19[%c0_77, %c0_78] : memref<1x96xf32, #tpu.memory_space<vmem>>, vector<1x96xf32>
    %209 = vector.broadcast %208 : vector<1x96xf32> to vector<16x96xf32>
    %210 = arith.addf %207, %209 : vector<16x96xf32>
    %211 = vector.extract_strided_slice %210 {offsets = [0, 0], sizes = [16, 8], strides = [1, 1]} : vector<16x96xf32> to vector<16x8xf32>
    %212 = arith.truncf %211 : vector<16x8xf32> to vector<16x8xbf16>
    %213 = vector.extract_strided_slice %210 {offsets = [0, 32], sizes = [16, 8], strides = [1, 1]} : vector<16x96xf32> to vector<16x8xf32>
    %214 = arith.truncf %213 : vector<16x8xf32> to vector<16x8xbf16>
    %215 = vector.extract_strided_slice %210 {offsets = [0, 64], sizes = [16, 8], strides = [1, 1]} : vector<16x96xf32> to vector<16x8xf32>
    %216 = arith.truncf %215 : vector<16x8xf32> to vector<16x8xbf16>
    %cst_79 = arith.constant dense<0.000000e+00> : vector<16x16xf32>
    %217 = tpu.matmul %212, %214, %cst_79 {dimension_numbers = #tpu.dot_dimension_numbers<[1], [1], [0], [0], [0, 0, 1, 0], [], []>} : vector<16x8xbf16>, vector<16x8xbf16>, vector<16x16xf32> -> vector<16x16xf32>
    %cst_80 = arith.constant 0.353553385 : f32
    %218 = vector.broadcast %cst_80 : f32 to vector<16x16xf32>
    %219 = arith.mulf %217, %218 : vector<16x16xf32>
    %220 = arith.addf %219, %5 : vector<16x16xf32>
    %cst_81 = arith.constant dense<0xFF800000> : vector<16xf32>
    %221 = vector.multi_reduction <maximumf>, %220, %cst_81 [1] : vector<16x16xf32> to vector<16xf32>
    %222 = vector.shape_cast %221 : vector<16xf32> to vector<16x1xf32>
    %223 = vector.broadcast %222 : vector<16x1xf32> to vector<16x16xf32>
    %224 = arith.subf %220, %223 : vector<16x16xf32>
    %225 = math.exp %224 : vector<16x16xf32>
    %cst_82 = arith.constant dense<0.000000e+00> : vector<16xf32>
    %226 = vector.multi_reduction <add>, %225, %cst_82 [1] : vector<16x16xf32> to vector<16xf32>
    %227 = vector.shape_cast %226 : vector<16xf32> to vector<16x1xf32>
    %228 = tpu.reciprocal %227 {approx = true} : vector<16x1xf32> -> vector<16x1xf32>
    %229 = vector.broadcast %228 : vector<16x1xf32> to vector<16x16xf32>
    %230 = arith.mulf %225, %229 : vector<16x16xf32>
    %231 = arith.truncf %230 : vector<16x16xf32> to vector<16x16xbf16>
    %cst_83 = arith.constant dense<0.000000e+00> : vector<16x8xf32>
    %232 = tpu.matmul %231, %216, %cst_83 {dimension_numbers = #tpu.dot_dimension_numbers<[1], [0], [0], [1], [0, 0, 1, 1], [], []>} : vector<16x16xbf16>, vector<16x8xbf16>, vector<16x8xf32> -> vector<16x8xf32>
    %233 = vector.extract_strided_slice %210 {offsets = [0, 8], sizes = [16, 8], strides = [1, 1]} : vector<16x96xf32> to vector<16x8xf32>
    %234 = arith.truncf %233 : vector<16x8xf32> to vector<16x8xbf16>
    %235 = vector.extract_strided_slice %210 {offsets = [0, 40], sizes = [16, 8], strides = [1, 1]} : vector<16x96xf32> to vector<16x8xf32>
    %236 = arith.truncf %235 : vector<16x8xf32> to vector<16x8xbf16>
    %237 = vector.extract_strided_slice %210 {offsets = [0, 72], sizes = [16, 8], strides = [1, 1]} : vector<16x96xf32> to vector<16x8xf32>
    %238 = arith.truncf %237 : vector<16x8xf32> to vector<16x8xbf16>
    %cst_84 = arith.constant dense<0.000000e+00> : vector<16x16xf32>
    %239 = tpu.matmul %234, %236, %cst_84 {dimension_numbers = #tpu.dot_dimension_numbers<[1], [1], [0], [0], [0, 0, 1, 0], [], []>} : vector<16x8xbf16>, vector<16x8xbf16>, vector<16x16xf32> -> vector<16x16xf32>
    %cst_85 = arith.constant 0.353553385 : f32
    %240 = vector.broadcast %cst_85 : f32 to vector<16x16xf32>
    %241 = arith.mulf %239, %240 : vector<16x16xf32>
    %242 = arith.addf %241, %5 : vector<16x16xf32>
    %cst_86 = arith.constant dense<0xFF800000> : vector<16xf32>
    %243 = vector.multi_reduction <maximumf>, %242, %cst_86 [1] : vector<16x16xf32> to vector<16xf32>
    %244 = vector.shape_cast %243 : vector<16xf32> to vector<16x1xf32>
    %245 = vector.broadcast %244 : vector<16x1xf32> to vector<16x16xf32>
    %246 = arith.subf %242, %245 : vector<16x16xf32>
    %247 = math.exp %246 : vector<16x16xf32>
    %cst_87 = arith.constant dense<0.000000e+00> : vector<16xf32>
    %248 = vector.multi_reduction <add>, %247, %cst_87 [1] : vector<16x16xf32> to vector<16xf32>
    %249 = vector.shape_cast %248 : vector<16xf32> to vector<16x1xf32>
    %250 = tpu.reciprocal %249 {approx = true} : vector<16x1xf32> -> vector<16x1xf32>
    %251 = vector.broadcast %250 : vector<16x1xf32> to vector<16x16xf32>
    %252 = arith.mulf %247, %251 : vector<16x16xf32>
    %253 = arith.truncf %252 : vector<16x16xf32> to vector<16x16xbf16>
    %cst_88 = arith.constant dense<0.000000e+00> : vector<16x8xf32>
    %254 = tpu.matmul %253, %238, %cst_88 {dimension_numbers = #tpu.dot_dimension_numbers<[1], [0], [0], [1], [0, 0, 1, 1], [], []>} : vector<16x16xbf16>, vector<16x8xbf16>, vector<16x8xf32> -> vector<16x8xf32>
    %255 = vector.extract_strided_slice %210 {offsets = [0, 16], sizes = [16, 8], strides = [1, 1]} : vector<16x96xf32> to vector<16x8xf32>
    %256 = arith.truncf %255 : vector<16x8xf32> to vector<16x8xbf16>
    %257 = vector.extract_strided_slice %210 {offsets = [0, 48], sizes = [16, 8], strides = [1, 1]} : vector<16x96xf32> to vector<16x8xf32>
    %258 = arith.truncf %257 : vector<16x8xf32> to vector<16x8xbf16>
    %259 = vector.extract_strided_slice %210 {offsets = [0, 80], sizes = [16, 8], strides = [1, 1]} : vector<16x96xf32> to vector<16x8xf32>
    %260 = arith.truncf %259 : vector<16x8xf32> to vector<16x8xbf16>
    %cst_89 = arith.constant dense<0.000000e+00> : vector<16x16xf32>
    %261 = tpu.matmul %256, %258, %cst_89 {dimension_numbers = #tpu.dot_dimension_numbers<[1], [1], [0], [0], [0, 0, 1, 0], [], []>} : vector<16x8xbf16>, vector<16x8xbf16>, vector<16x16xf32> -> vector<16x16xf32>
    %cst_90 = arith.constant 0.353553385 : f32
    %262 = vector.broadcast %cst_90 : f32 to vector<16x16xf32>
    %263 = arith.mulf %261, %262 : vector<16x16xf32>
    %264 = arith.addf %263, %5 : vector<16x16xf32>
    %cst_91 = arith.constant dense<0xFF800000> : vector<16xf32>
    %265 = vector.multi_reduction <maximumf>, %264, %cst_91 [1] : vector<16x16xf32> to vector<16xf32>
    %266 = vector.shape_cast %265 : vector<16xf32> to vector<16x1xf32>
    %267 = vector.broadcast %266 : vector<16x1xf32> to vector<16x16xf32>
    %268 = arith.subf %264, %267 : vector<16x16xf32>
    %269 = math.exp %268 : vector<16x16xf32>
    %cst_92 = arith.constant dense<0.000000e+00> : vector<16xf32>
    %270 = vector.multi_reduction <add>, %269, %cst_92 [1] : vector<16x16xf32> to vector<16xf32>
    %271 = vector.shape_cast %270 : vector<16xf32> to vector<16x1xf32>
    %272 = tpu.reciprocal %271 {approx = true} : vector<16x1xf32> -> vector<16x1xf32>
    %273 = vector.broadcast %272 : vector<16x1xf32> to vector<16x16xf32>
    %274 = arith.mulf %269, %273 : vector<16x16xf32>
    %275 = arith.truncf %274 : vector<16x16xf32> to vector<16x16xbf16>
    %cst_93 = arith.constant dense<0.000000e+00> : vector<16x8xf32>
    %276 = tpu.matmul %275, %260, %cst_93 {dimension_numbers = #tpu.dot_dimension_numbers<[1], [0], [0], [1], [0, 0, 1, 1], [], []>} : vector<16x16xbf16>, vector<16x8xbf16>, vector<16x8xf32> -> vector<16x8xf32>
    %277 = vector.extract_strided_slice %210 {offsets = [0, 24], sizes = [16, 8], strides = [1, 1]} : vector<16x96xf32> to vector<16x8xf32>
    %278 = arith.truncf %277 : vector<16x8xf32> to vector<16x8xbf16>
    %279 = vector.extract_strided_slice %210 {offsets = [0, 56], sizes = [16, 8], strides = [1, 1]} : vector<16x96xf32> to vector<16x8xf32>
    %280 = arith.truncf %279 : vector<16x8xf32> to vector<16x8xbf16>
    %281 = vector.extract_strided_slice %210 {offsets = [0, 88], sizes = [16, 8], strides = [1, 1]} : vector<16x96xf32> to vector<16x8xf32>
    %282 = arith.truncf %281 : vector<16x8xf32> to vector<16x8xbf16>
    %cst_94 = arith.constant dense<0.000000e+00> : vector<16x16xf32>
    %283 = tpu.matmul %278, %280, %cst_94 {dimension_numbers = #tpu.dot_dimension_numbers<[1], [1], [0], [0], [0, 0, 1, 0], [], []>} : vector<16x8xbf16>, vector<16x8xbf16>, vector<16x16xf32> -> vector<16x16xf32>
    %cst_95 = arith.constant 0.353553385 : f32
    %284 = vector.broadcast %cst_95 : f32 to vector<16x16xf32>
    %285 = arith.mulf %283, %284 : vector<16x16xf32>
    %286 = arith.addf %285, %5 : vector<16x16xf32>
    %cst_96 = arith.constant dense<0xFF800000> : vector<16xf32>
    %287 = vector.multi_reduction <maximumf>, %286, %cst_96 [1] : vector<16x16xf32> to vector<16xf32>
    %288 = vector.shape_cast %287 : vector<16xf32> to vector<16x1xf32>
    %289 = vector.broadcast %288 : vector<16x1xf32> to vector<16x16xf32>
    %290 = arith.subf %286, %289 : vector<16x16xf32>
    %291 = math.exp %290 : vector<16x16xf32>
    %cst_97 = arith.constant dense<0.000000e+00> : vector<16xf32>
    %292 = vector.multi_reduction <add>, %291, %cst_97 [1] : vector<16x16xf32> to vector<16xf32>
    %293 = vector.shape_cast %292 : vector<16xf32> to vector<16x1xf32>
    %294 = tpu.reciprocal %293 {approx = true} : vector<16x1xf32> -> vector<16x1xf32>
    %295 = vector.broadcast %294 : vector<16x1xf32> to vector<16x16xf32>
    %296 = arith.mulf %291, %295 : vector<16x16xf32>
    %297 = arith.truncf %296 : vector<16x16xf32> to vector<16x16xbf16>
    %cst_98 = arith.constant dense<0.000000e+00> : vector<16x8xf32>
    %298 = tpu.matmul %297, %282, %cst_98 {dimension_numbers = #tpu.dot_dimension_numbers<[1], [0], [0], [1], [0, 0, 1, 1], [], []>} : vector<16x16xbf16>, vector<16x8xbf16>, vector<16x8xf32> -> vector<16x8xf32>
    %299 = tpu.concatenate %232, %254, %276, %298 in 1 : vector<16x8xf32>, vector<16x8xf32>, vector<16x8xf32>, vector<16x8xf32> -> vector<16x32xf32>
    %300 = arith.truncf %299 : vector<16x32xf32> to vector<16x32xbf16>
    %c0_99 = arith.constant 0 : index
    %c0_100 = arith.constant 0 : index
    %301 = vector.load %arg20[%c0_99, %c0_100] : memref<32x32xbf16, #tpu.memory_space<vmem>>, vector<32x32xbf16>
    %cst_101 = arith.constant dense<0.000000e+00> : vector<16x32xf32>
    %302 = tpu.matmul %300, %301, %cst_101 {dimension_numbers = #tpu.dot_dimension_numbers<[1], [0], [0], [1], [0, 0, 1, 1], [], []>} : vector<16x32xbf16>, vector<32x32xbf16>, vector<16x32xf32> -> vector<16x32xf32>
    %c0_102 = arith.constant 0 : index
    %c0_103 = arith.constant 0 : index
    %303 = vector.load %arg21[%c0_102, %c0_103] : memref<1x32xf32, #tpu.memory_space<vmem>>, vector<1x32xf32>
    %304 = vector.broadcast %303 : vector<1x32xf32> to vector<16x32xf32>
    %305 = arith.addf %302, %304 : vector<16x32xf32>
    %306 = arith.addf %180, %305 : vector<16x32xf32>
    %cst_104 = arith.constant dense<0.000000e+00> : vector<16xf32>
    %307 = vector.multi_reduction <add>, %306, %cst_104 [1] : vector<16x32xf32> to vector<16xf32>
    %308 = vector.shape_cast %307 : vector<16xf32> to vector<16x1xf32>
    %cst_105 = arith.constant 3.200000e+01 : f32
    %309 = vector.broadcast %cst_105 : f32 to vector<16x1xf32>
    %310 = arith.divf %308, %309 : vector<16x1xf32>
    %311 = vector.broadcast %310 : vector<16x1xf32> to vector<16x32xf32>
    %312 = arith.subf %306, %311 : vector<16x32xf32>
    %313 = arith.mulf %312, %312 : vector<16x32xf32>
    %cst_106 = arith.constant dense<0.000000e+00> : vector<16xf32>
    %314 = vector.multi_reduction <add>, %313, %cst_106 [1] : vector<16x32xf32> to vector<16xf32>
    %315 = vector.shape_cast %314 : vector<16xf32> to vector<16x1xf32>
    %cst_107 = arith.constant 3.200000e+01 : f32
    %316 = vector.broadcast %cst_107 : f32 to vector<16x1xf32>
    %317 = arith.divf %315, %316 : vector<16x1xf32>
    %318 = vector.broadcast %310 : vector<16x1xf32> to vector<16x32xf32>
    %319 = arith.subf %306, %318 : vector<16x32xf32>
    %cst_108 = arith.constant 9.99999974E-6 : f32
    %320 = vector.broadcast %cst_108 : f32 to vector<16x1xf32>
    %321 = arith.addf %317, %320 : vector<16x1xf32>
    %322 = math.rsqrt %321 : vector<16x1xf32>
    %323 = vector.broadcast %322 : vector<16x1xf32> to vector<16x32xf32>
    %324 = arith.mulf %319, %323 : vector<16x32xf32>
    %c0_109 = arith.constant 0 : index
    %c0_110 = arith.constant 0 : index
    %325 = vector.load %arg22[%c0_109, %c0_110] : memref<1x32xf32, #tpu.memory_space<vmem>>, vector<1x32xf32>
    %326 = vector.broadcast %325 : vector<1x32xf32> to vector<16x32xf32>
    %327 = arith.mulf %324, %326 : vector<16x32xf32>
    %c0_111 = arith.constant 0 : index
    %c0_112 = arith.constant 0 : index
    %328 = vector.load %arg23[%c0_111, %c0_112] : memref<1x32xf32, #tpu.memory_space<vmem>>, vector<1x32xf32>
    %329 = vector.broadcast %328 : vector<1x32xf32> to vector<16x32xf32>
    %330 = arith.addf %327, %329 : vector<16x32xf32>
    %331 = arith.truncf %330 : vector<16x32xf32> to vector<16x32xbf16>
    %c0_113 = arith.constant 0 : index
    %c0_114 = arith.constant 0 : index
    %332 = vector.load %arg24[%c0_113, %c0_114] : memref<32x128xbf16, #tpu.memory_space<vmem>>, vector<32x128xbf16>
    %cst_115 = arith.constant dense<0.000000e+00> : vector<16x128xf32>
    %333 = tpu.matmul %331, %332, %cst_115 {dimension_numbers = #tpu.dot_dimension_numbers<[1], [0], [0], [1], [0, 0, 1, 1], [], []>} : vector<16x32xbf16>, vector<32x128xbf16>, vector<16x128xf32> -> vector<16x128xf32>
    %c0_116 = arith.constant 0 : index
    %c0_117 = arith.constant 0 : index
    %334 = vector.load %arg25[%c0_116, %c0_117] : memref<1x128xf32, #tpu.memory_space<vmem>>, vector<1x128xf32>
    %335 = vector.broadcast %334 : vector<1x128xf32> to vector<16x128xf32>
    %336 = arith.addf %333, %335 : vector<16x128xf32>
    %cst_118 = arith.constant 1.702000e+00 : f32
    %337 = vector.broadcast %cst_118 : f32 to vector<16x128xf32>
    %338 = arith.mulf %337, %336 : vector<16x128xf32>
    %339 = arith.negf %338 : vector<16x128xf32>
    %340 = math.exp %339 : vector<16x128xf32>
    %cst_119 = arith.constant 1.000000e+00 : f32
    %341 = vector.broadcast %cst_119 : f32 to vector<16x128xf32>
    %342 = arith.addf %341, %340 : vector<16x128xf32>
    %343 = arith.divf %341, %342 : vector<16x128xf32>
    %344 = arith.mulf %336, %343 : vector<16x128xf32>
    %345 = arith.truncf %344 : vector<16x128xf32> to vector<16x128xbf16>
    %c0_120 = arith.constant 0 : index
    %c0_121 = arith.constant 0 : index
    %346 = vector.load %arg26[%c0_120, %c0_121] : memref<128x32xbf16, #tpu.memory_space<vmem>>, vector<128x32xbf16>
    %cst_122 = arith.constant dense<0.000000e+00> : vector<16x32xf32>
    %347 = tpu.matmul %345, %346, %cst_122 {dimension_numbers = #tpu.dot_dimension_numbers<[1], [0], [0], [1], [0, 0, 1, 1], [], []>} : vector<16x128xbf16>, vector<128x32xbf16>, vector<16x32xf32> -> vector<16x32xf32>
    %c0_123 = arith.constant 0 : index
    %c0_124 = arith.constant 0 : index
    %348 = vector.load %arg27[%c0_123, %c0_124] : memref<1x32xf32, #tpu.memory_space<vmem>>, vector<1x32xf32>
    %349 = vector.broadcast %348 : vector<1x32xf32> to vector<16x32xf32>
    %350 = arith.addf %347, %349 : vector<16x32xf32>
    %351 = arith.addf %306, %350 : vector<16x32xf32>
    %cst_125 = arith.constant dense<0.000000e+00> : vector<16xf32>
    %352 = vector.multi_reduction <add>, %351, %cst_125 [1] : vector<16x32xf32> to vector<16xf32>
    %353 = vector.shape_cast %352 : vector<16xf32> to vector<16x1xf32>
    %cst_126 = arith.constant 3.200000e+01 : f32
    %354 = vector.broadcast %cst_126 : f32 to vector<16x1xf32>
    %355 = arith.divf %353, %354 : vector<16x1xf32>
    %356 = vector.broadcast %355 : vector<16x1xf32> to vector<16x32xf32>
    %357 = arith.subf %351, %356 : vector<16x32xf32>
    %358 = arith.mulf %357, %357 : vector<16x32xf32>
    %cst_127 = arith.constant dense<0.000000e+00> : vector<16xf32>
    %359 = vector.multi_reduction <add>, %358, %cst_127 [1] : vector<16x32xf32> to vector<16xf32>
    %360 = vector.shape_cast %359 : vector<16xf32> to vector<16x1xf32>
    %cst_128 = arith.constant 3.200000e+01 : f32
    %361 = vector.broadcast %cst_128 : f32 to vector<16x1xf32>
    %362 = arith.divf %360, %361 : vector<16x1xf32>
    %363 = vector.broadcast %355 : vector<16x1xf32> to vector<16x32xf32>
    %364 = arith.subf %351, %363 : vector<16x32xf32>
    %cst_129 = arith.constant 9.99999974E-6 : f32
    %365 = vector.broadcast %cst_129 : f32 to vector<16x1xf32>
    %366 = arith.addf %362, %365 : vector<16x1xf32>
    %367 = math.rsqrt %366 : vector<16x1xf32>
    %368 = vector.broadcast %367 : vector<16x1xf32> to vector<16x32xf32>
    %369 = arith.mulf %364, %368 : vector<16x32xf32>
    %c0_130 = arith.constant 0 : index
    %c0_131 = arith.constant 0 : index
    %370 = vector.load %arg28[%c0_130, %c0_131] : memref<1x32xf32, #tpu.memory_space<vmem>>, vector<1x32xf32>
    %371 = vector.broadcast %370 : vector<1x32xf32> to vector<16x32xf32>
    %372 = arith.mulf %369, %371 : vector<16x32xf32>
    %c0_132 = arith.constant 0 : index
    %c0_133 = arith.constant 0 : index
    %373 = vector.load %arg29[%c0_132, %c0_133] : memref<1x32xf32, #tpu.memory_space<vmem>>, vector<1x32xf32>
    %374 = vector.broadcast %373 : vector<1x32xf32> to vector<16x32xf32>
    %375 = arith.addf %372, %374 : vector<16x32xf32>
    %c0_134 = arith.constant 0 : index
    %376 = memref.load %arg1[%c0_134] : memref<1xi32, #tpu.memory_space<smem>>
    %377 = tpu.iota {dimensions = array<i32: 0>} : vector<16x1xi32>
    %378 = vector.broadcast %376 : i32 to vector<16x1xi32>
    %379 = arith.cmpi eq, %377, %378 : vector<16x1xi32>
    %380 = arith.extui %379 : vector<16x1xi1> to vector<16x1xi32>
    %381 = arith.sitofp %380 : vector<16x1xi32> to vector<16x1xf32>
    %382 = vector.broadcast %381 : vector<16x1xf32> to vector<16x32xf32>
    %383 = arith.mulf %375, %382 : vector<16x32xf32>
    %cst_135 = arith.constant dense<0.000000e+00> : vector<32xf32>
    %384 = vector.multi_reduction <add>, %383, %cst_135 [0] : vector<16x32xf32> to vector<32xf32>
    %385 = vector.shape_cast %384 : vector<32xf32> to vector<1x32xf32>
    %386 = arith.truncf %385 : vector<1x32xf32> to vector<1x32xbf16>
    %c0_136 = arith.constant 0 : index
    %c0_137 = arith.constant 0 : index
    %387 = vector.load %arg30[%c0_136, %c0_137] : memref<32x32xbf16, #tpu.memory_space<vmem>>, vector<32x32xbf16>
    %cst_138 = arith.constant dense<0.000000e+00> : vector<1x32xf32>
    %388 = tpu.matmul %386, %387, %cst_138 {dimension_numbers = #tpu.dot_dimension_numbers<[1], [0], [0], [1], [0, 0, 1, 1], [], []>} : vector<1x32xbf16>, vector<32x32xbf16>, vector<1x32xf32> -> vector<1x32xf32>
    %c0_139 = arith.constant 0 : index
    %c0_140 = arith.constant 0 : index
    %c0_141 = arith.constant 0 : index
    %389 = vector.load %arg31[%c0_139, %c0_140, %c0_141] : memref<1x1x32xf32, #tpu.memory_space<vmem>>, vector<1x1x32xf32>
    %390 = vector.shape_cast %389 : vector<1x1x32xf32> to vector<1x32xf32>
    %391 = vector.shape_cast %388 : vector<1x32xf32> to vector<1x1x32xf32>
    tpu.vector_store %arg31[%c0_139, %c0_140, %c0_141], %391 {strides = array<i32>} : memref<1x1x32xf32, #tpu.memory_space<vmem>>, vector<1x1x32xf32>,
    return
  }
  func.func @transform_0(%arg0: i32, %arg1: memref<1xi32, #tpu.memory_space<smem>>) -> (i32, i32, i32) {
    %c0_i32 = arith.constant 0 : i32
    %c0_i32_0 = arith.constant 0 : i32
    %c0_i32_1 = arith.constant 0 : i32
    return %arg0, %c0_i32, %c0_i32_0 : i32, i32, i32
  }
  func.func @transform_1(%arg0: i32, %arg1: memref<1xi32, #tpu.memory_space<smem>>) -> (i32, i32) {
    %c0_i32 = arith.constant 0 : i32
    %c0_i32_0 = arith.constant 0 : i32
    %c0_i32_1 = arith.constant 0 : i32
    return %c0_i32, %c0_i32_0 : i32, i32
  }
  func.func @transform_2(%arg0: i32, %arg1: memref<1xi32, #tpu.memory_space<smem>>) -> (i32, i32) {
    %c0_i32 = arith.constant 0 : i32
    %c0_i32_0 = arith.constant 0 : i32
    %c0_i32_1 = arith.constant 0 : i32
    return %c0_i32, %c0_i32_0 : i32, i32
  }
  func.func @transform_3(%arg0: i32, %arg1: memref<1xi32, #tpu.memory_space<smem>>) -> (i32, i32) {
    %c0_i32 = arith.constant 0 : i32
    %c0_i32_0 = arith.constant 0 : i32
    %c0_i32_1 = arith.constant 0 : i32
    return %c0_i32, %c0_i32_0 : i32, i32
  }
  func.func @transform_4(%arg0: i32, %arg1: memref<1xi32, #tpu.memory_space<smem>>) -> (i32, i32) {
    %c0_i32 = arith.constant 0 : i32
    %c0_i32_0 = arith.constant 0 : i32
    %c0_i32_1 = arith.constant 0 : i32
    return %c0_i32, %c0_i32_0 : i32, i32
  }
  func.func @transform_5(%arg0: i32, %arg1: memref<1xi32, #tpu.memory_space<smem>>) -> (i32, i32) {
    %c0_i32 = arith.constant 0 : i32
    %c0_i32_0 = arith.constant 0 : i32
    %c0_i32_1 = arith.constant 0 : i32
    return %c0_i32, %c0_i32_0 : i32, i32
  }
  func.func @transform_6(%arg0: i32, %arg1: memref<1xi32, #tpu.memory_space<smem>>) -> (i32, i32) {
    %c0_i32 = arith.constant 0 : i32
    %c0_i32_0 = arith.constant 0 : i32
    %c0_i32_1 = arith.constant 0 : i32
    return %c0_i32, %c0_i32_0 : i32, i32
  }
  func.func @transform_7(%arg0: i32, %arg1: memref<1xi32, #tpu.memory_space<smem>>) -> (i32, i32) {
    %c0_i32 = arith.constant 0 : i32
    %c0_i32_0 = arith.constant 0 : i32
    %c0_i32_1 = arith.constant 0 : i32
    return %c0_i32, %c0_i32_0 : i32, i32
  }
  func.func @transform_8(%arg0: i32, %arg1: memref<1xi32, #tpu.memory_space<smem>>) -> (i32, i32) {
    %c0_i32 = arith.constant 0 : i32
    %c0_i32_0 = arith.constant 0 : i32
    %c0_i32_1 = arith.constant 0 : i32
    return %c0_i32, %c0_i32_0 : i32, i32
  }
  func.func @transform_9(%arg0: i32, %arg1: memref<1xi32, #tpu.memory_space<smem>>) -> (i32, i32) {
    %c0_i32 = arith.constant 0 : i32
    %c0_i32_0 = arith.constant 0 : i32
    %c0_i32_1 = arith.constant 0 : i32
    return %c0_i32, %c0_i32_0 : i32, i32
  }
  func.func @transform_10(%arg0: i32, %arg1: memref<1xi32, #tpu.memory_space<smem>>) -> (i32, i32) {
    %c0_i32 = arith.constant 0 : i32
    %c0_i32_0 = arith.constant 0 : i32
    %c0_i32_1 = arith.constant 0 : i32
    return %c0_i32, %c0_i32_0 : i32, i32
  }
  func.func @transform_11(%arg0: i32, %arg1: memref<1xi32, #tpu.memory_space<smem>>) -> (i32, i32) {
    %c0_i32 = arith.constant 0 : i32
    %c0_i32_0 = arith.constant 0 : i32
    %c0_i32_1 = arith.constant 0 : i32
    return %c0_i32, %c0_i32_0 : i32, i32
  }
  func.func @transform_12(%arg0: i32, %arg1: memref<1xi32, #tpu.memory_space<smem>>) -> (i32, i32) {
    %c0_i32 = arith.constant 0 : i32
    %c0_i32_0 = arith.constant 0 : i32
    %c0_i32_1 = arith.constant 0 : i32
    return %c0_i32, %c0_i32_0 : i32, i32
  }
  func.func @transform_13(%arg0: i32, %arg1: memref<1xi32, #tpu.memory_space<smem>>) -> (i32, i32) {
    %c0_i32 = arith.constant 0 : i32
    %c0_i32_0 = arith.constant 0 : i32
    %c0_i32_1 = arith.constant 0 : i32
    return %c0_i32, %c0_i32_0 : i32, i32
  }
  func.func @transform_14(%arg0: i32, %arg1: memref<1xi32, #tpu.memory_space<smem>>) -> (i32, i32) {
    %c0_i32 = arith.constant 0 : i32
    %c0_i32_0 = arith.constant 0 : i32
    %c0_i32_1 = arith.constant 0 : i32
    return %c0_i32, %c0_i32_0 : i32, i32
  }
  func.func @transform_15(%arg0: i32, %arg1: memref<1xi32, #tpu.memory_space<smem>>) -> (i32, i32) {
    %c0_i32 = arith.constant 0 : i32
    %c0_i32_0 = arith.constant 0 : i32
    %c0_i32_1 = arith.constant 0 : i32
    return %c0_i32, %c0_i32_0 : i32, i32
  }
  func.func @transform_16(%arg0: i32, %arg1: memref<1xi32, #tpu.memory_space<smem>>) -> (i32, i32) {
    %c0_i32 = arith.constant 0 : i32
    %c0_i32_0 = arith.constant 0 : i32
    %c0_i32_1 = arith.constant 0 : i32
    return %c0_i32, %c0_i32_0 : i32, i32
  }
  func.func @transform_17(%arg0: i32, %arg1: memref<1xi32, #tpu.memory_space<smem>>) -> (i32, i32) {
    %c0_i32 = arith.constant 0 : i32
    %c0_i32_0 = arith.constant 0 : i32
    %c0_i32_1 = arith.constant 0 : i32
    return %c0_i32, %c0_i32_0 : i32, i32
  }
  func.func @transform_18(%arg0: i32, %arg1: memref<1xi32, #tpu.memory_space<smem>>) -> (i32, i32) {
    %c0_i32 = arith.constant 0 : i32
    %c0_i32_0 = arith.constant 0 : i32
    %c0_i32_1 = arith.constant 0 : i32
    return %c0_i32, %c0_i32_0 : i32, i32
  }
  func.func @transform_19(%arg0: i32, %arg1: memref<1xi32, #tpu.memory_space<smem>>) -> (i32, i32) {
    %c0_i32 = arith.constant 0 : i32
    %c0_i32_0 = arith.constant 0 : i32
    %c0_i32_1 = arith.constant 0 : i32
    return %c0_i32, %c0_i32_0 : i32, i32
  }
  func.func @transform_20(%arg0: i32, %arg1: memref<1xi32, #tpu.memory_space<smem>>) -> (i32, i32) {
    %c0_i32 = arith.constant 0 : i32
    %c0_i32_0 = arith.constant 0 : i32
    %c0_i32_1 = arith.constant 0 : i32
    return %c0_i32, %c0_i32_0 : i32, i32
  }
  func.func @transform_21(%arg0: i32, %arg1: memref<1xi32, #tpu.memory_space<smem>>) -> (i32, i32) {
    %c0_i32 = arith.constant 0 : i32
    %c0_i32_0 = arith.constant 0 : i32
    %c0_i32_1 = arith.constant 0 : i32
    return %c0_i32, %c0_i32_0 : i32, i32
  }
  func.func @transform_22(%arg0: i32, %arg1: memref<1xi32, #tpu.memory_space<smem>>) -> (i32, i32) {
    %c0_i32 = arith.constant 0 : i32
    %c0_i32_0 = arith.constant 0 : i32
    %c0_i32_1 = arith.constant 0 : i32
    return %c0_i32, %c0_i32_0 : i32, i32
  }
  func.func @transform_23(%arg0: i32, %arg1: memref<1xi32, #tpu.memory_space<smem>>) -> (i32, i32) {
    %c0_i32 = arith.constant 0 : i32
    %c0_i32_0 = arith.constant 0 : i32
    %c0_i32_1 = arith.constant 0 : i32
    return %c0_i32, %c0_i32_0 : i32, i32
  }
  func.func @transform_24(%arg0: i32, %arg1: memref<1xi32, #tpu.memory_space<smem>>) -> (i32, i32) {
    %c0_i32 = arith.constant 0 : i32
    %c0_i32_0 = arith.constant 0 : i32
    %c0_i32_1 = arith.constant 0 : i32
    return %c0_i32, %c0_i32_0 : i32, i32
  }
  func.func @transform_25(%arg0: i32, %arg1: memref<1xi32, #tpu.memory_space<smem>>) -> (i32, i32) {
    %c0_i32 = arith.constant 0 : i32
    %c0_i32_0 = arith.constant 0 : i32
    %c0_i32_1 = arith.constant 0 : i32
    return %c0_i32, %c0_i32_0 : i32, i32
  }
  func.func @transform_26(%arg0: i32, %arg1: memref<1xi32, #tpu.memory_space<smem>>) -> (i32, i32) {
    %c0_i32 = arith.constant 0 : i32
    %c0_i32_0 = arith.constant 0 : i32
    %c0_i32_1 = arith.constant 0 : i32
    return %c0_i32, %c0_i32_0 : i32, i32
  }
  func.func @transform_27(%arg0: i32, %arg1: memref<1xi32, #tpu.memory_space<smem>>) -> (i32, i32) {
    %c0_i32 = arith.constant 0 : i32
    %c0_i32_0 = arith.constant 0 : i32
    %c0_i32_1 = arith.constant 0 : i32
    return %c0_i32, %c0_i32_0 : i32, i32
  }
  func.func @transform_28(%arg0: i32, %arg1: memref<1xi32, #tpu.memory_space<smem>>) -> (i32, i32) {
    %c0_i32 = arith.constant 0 : i32
    %c0_i32_0 = arith.constant 0 : i32
    %c0_i32_1 = arith.constant 0 : i32
    return %c0_i32, %c0_i32_0 : i32, i32
  }
  func.func @transform_29(%arg0: i32, %arg1: memref<1xi32, #tpu.memory_space<smem>>) -> (i32, i32, i32) {
    %c0_i32 = arith.constant 0 : i32
    %c0_i32_0 = arith.constant 0 : i32
    %c0_i32_1 = arith.constant 0 : i32
    return %arg0, %c0_i32, %c0_i32_0 : i32, i32, i32
  }
}

</mosaic_0001>

<bundles_post_ra>
// kernel: tpu_custom_call.1
= control target key start
LH: loop header
LB: loop body
LE: loop exit
PB: predicated region body
PF: predicated region fallthrough
CT: control target
= control target key end

     0   :  { %s3914_s6 = smov 1   ;;  %s3915_s10 = smov 2   ;;  %s4667_s0 = inlined_call_operand.smem [shape: u32[31], index: -1, kind: input, shape index: {}] }
   0x1   :  { %s3972_s5 = sld [smem:[%s4667_s0]]   ;;  %s3916_s14 = smov 3  }
   0x2   :  { %s3977_s9 = sld [smem:[%s4667_s0 + %s3914_s6]]   ;;  %s3917_s18 = smov 4  }
   0x3   :  { %s3982_s13 = sld [smem:[%s4667_s0 + %s3915_s10]]   ;;  %s3918_s22 = smov 5  }
   0x4   :  { %s3987_s17 = sld [smem:[%s4667_s0 + %s3916_s14]]   ;;  %s3919_s26 = smov 6  }
   0x5   :  { %s3992_s21 = sld [smem:[%s4667_s0 + %s3917_s18]]   ;;  %s3920_s30 = smov 7  }
   0x6   :  { %s3997_s25 = sld [smem:[%s4667_s0 + %s3918_s22]]   ;;  %s3921_s4 = smov 8  }
   0x7   :  { %s4002_s29 = sld [smem:[%s4667_s0 + %s3919_s26]]   ;;  %s3922_s10 = smov 9  }
   0x8   :  { %s4007_s3 = sld [smem:[%s4667_s0 + %s3920_s30]]   ;;  %s3923_s15 = smov 10  }
   0x9   :  { %s4012_s8 = sld [smem:[%s4667_s0 + %s3921_s4]]   ;;  %s3924_s20 = smov 11  }
   0xa   :  { %s4017_s14 = sld [smem:[%s4667_s0 + %s3922_s10]]   ;;  %s3925_s26 = smov 12  }
   0xb   :  { %s4022_s19 = sld [smem:[%s4667_s0 + %s3923_s15]]   ;;  %s3926_s1 = smov 13  }
   0xc   :  { %s4027_s24 = sld [smem:[%s4667_s0 + %s3924_s20]]   ;;  %s3927_s7 = smov 14  }
   0xd   :  { %s4032_s30 = sld [smem:[%s4667_s0 + %s3925_s26]]   ;;  %s3928_s15 = smov 15  }
   0xe   :  { %4690 = sst [smem:[#allocation14_spill]] %s4007_s3  ;;  %s3929_s22 = smov 16  }
   0xf   :  { %s4037_s6 = sld [smem:[%s4667_s0 + %s3926_s1]]   ;;  %s3930_s28 = smov 17  }
  0x10   :  { %s4042_s12 = sld [smem:[%s4667_s0 + %s3927_s7]]   ;;  %s3931_s7 = smov 18  }
  0x11   :  { %s4047_s20 = sld [smem:[%s4667_s0 + %s3928_s15]]   ;;  %s3932_s15 = smov 19  }
  0x12   :  { %s4052_s27 = sld [smem:[%s4667_s0 + %s3929_s22]]   ;;  %s3933_s22 = smov 20  }
  0x13   :  { %s4057_s4 = sld [smem:[%s4667_s0 + %s3930_s28]]   ;;  %s3934_s28 = smov 21  }
  0x14   :  { %66 = sst [smem:[#allocation3]] %s3972_s5 }
  0x16   :  { %4691 = sst [smem:[#allocation15_spill]] %s4042_s12 }
  0x17   :  { %4692 = sst [smem:[#allocation16_spill]] %s4047_s20 }
  0x18   :  { %4693 = sst [smem:[#allocation17_spill]] %s4052_s27 }
  0x19   :  { %4694 = sst [smem:[#allocation18_spill]] %s4057_s4 }
  0x1a   :  { %s4062_s12 = sld [smem:[%s4667_s0 + %s3931_s7]]   ;;  %s3935_s7 = smov 22  }
  0x1b   :  { %s4067_s20 = sld [smem:[%s4667_s0 + %s3932_s15]]   ;;  %s3936_s15 = smov 23  }
  0x1c   :  { %s4072_s27 = sld [smem:[%s4667_s0 + %s3933_s22]]   ;;  %s3937_s22 = smov 24  }
  0x1d   :  { %s4077_s4 = sld [smem:[%s4667_s0 + %s3934_s28]]   ;;  %s3938_s28 = smov 25  }
  0x1e   :  { %s4087_s23 = sld [smem:[%s4667_s0 + %s3936_s15]]   ;;  %s3940_s15 = smov 27  }
  0x1f   :  { %s4092_s1 = sld [smem:[%s4667_s0 + %s3937_s22]]  }
  0x20   :  { %4695 = sst [smem:[#allocation19_spill]] %s4062_s12 }
  0x21   :  { %4696 = sst [smem:[#allocation20_spill]] %s4067_s20 }
  0x22   :  { %4697 = sst [smem:[#allocation21_spill]] %s4072_s27  ;;  %s3941_s27 = smov 28  }
  0x23   :  { %4698 = sst [smem:[#allocation22_spill]] %s4077_s4  ;;  %s3942_s4 = smov 29  }
  0x24   :  { %s4082_s12 = sld [smem:[%s4667_s0 + %s3935_s7]]   ;;  %s3939_s7 = smov 26  }
  0x25   :  { %4700 = sst [smem:[#allocation24_spill]] %s4087_s23 }
  0x26   :  { %4701 = sst [smem:[#allocation25_spill]] %s4092_s1 }
  0x27   :  { %s4097_s10 = sld [smem:[%s4667_s0 + %s3938_s28]]  }
  0x28   :  { %s4102_s16 = sld [smem:[%s4667_s0 + %s3939_s7]]  }
  0x29   :  { %s4107_s20 = sld [smem:[%s4667_s0 + %s3940_s15]]  }
  0x2a   :  { %4699 = sst [smem:[#allocation23_spill]] %s4082_s12  ;;  %s3943_s12 = smov 30  }
  0x2b   :  { %s4112_s1 = sld [smem:[%s4667_s0 + %s3941_s27]]  }
  0x2d   :  { %4702 = sst [smem:[#allocation26_spill]] %s4097_s10 }
  0x2e   :  { %4703 = sst [smem:[#allocation27_spill]] %s4102_s16 }
  0x2f   :  { %s4117_s10 = sld [smem:[%s4667_s0 + %s3942_s4]]  }
  0x30   :  { %s4122_s16 = sld [smem:[%s4667_s0 + %s3943_s12]]  }
  0x31   :  { %4704 = sst [smem:[#allocation28_spill]] %s4112_s1 }
  0x32   :  { %67 = vsyncpa [#allocation5], 0 }
  0x33   :  { %68 = vsyncpa [#allocation8], 0 }
  0x34   :  { %69 = vsyncpa [#allocation6], 0 }
  0x35   :  { %71 = vsyncpa [#allocation6 + $0x1], 0  ;;  %s4125_s23 = smov 0   ;;  %s4127_s15 = smov 0  }
  0x36   :  { %s4129_s18 = smov 0   ;;  %s4131_s27 = smov 0  }
  0x37 LB: > { %s4705_s3 = sld [smem:[#allocation14_spill]]  ;;  %4706 = sst [smem:[#allocation29_spill]] %s3908_s18  ;;  %s3900_s23 = sphi %s4125_s23, %s4749_s23   ;;  %s3912_s27 = sphi %s4131_s27, %s4746_s27   ;;  %s3908_s18 = sphi %s4129_s18, %s4748_s18   ;;  %s3904_s15 = sphi %s4127_s15, %s4750_s15  }
  0x38   : > { %s4146_s0 = sadd.s32 4294967295, %s3912_s27   ;;  %s3126_s5 = sadd.s32 4294967294, %s3912_s27  }
  0x39   : > { %s4150_s22 = sadd.s32 1, %s3912_s27   ;;  %s698_s26 = sadd.s32 1, %s3908_s18 }
  0x3a   : > { %4707 = sst [smem:[#allocation30_spill]] %s4150_s22  ;;  %s695_s4 = ssub.s32 %s3912_s27, %s4150_s22 }
  0x3b   : > { %p708_p0 = scmp.ne.s32.totalorder %s3908_s18, %s3904_s15  ;;  %p696_p1 = scmp.eq.s32.totalorder %s695_s4, 0 }
  0x3c   : > { %p709_p2 = scmp.eq.s32.totalorder %s4146_s0, 1  ;;  %p714_p3 = scmp.ne.s32.totalorder %s3904_s15, %s3900_s23 }
  0x3d   : > { %p715_p4 = scmp.eq.s32.totalorder %s3126_s5, 1  ;;  %p3127_p7 = scmp.ge.s32.totalorder %s3912_s27, 1 }
  0x3e   : > { %s4161_s28 = scalar_select %p696_p1, %s3908_s18, %s698_s26  }
  0x3f   : > { %p4163_p5 = por %p709_p2, %p708_p0  ;;  %p4167_p6 = por %p715_p4, %p714_p3 }
  0x40   : > { %4708 = sst [smem:[#allocation31_spill]] %s4161_s28  ;;  %p722_p8 = scmp.lt.s32.totalorder %s3912_s27, 3 }
  0x41   : > { %s4709_s2 = scalar_select %p4163_p5, 1, 0 }
  0x42   : > { %s4710_s12 = scalar_select %p4167_p6, 1, 0 }
  0x43   : > { %p4676_p9 = scmp.eq.s32.totalorder %s4146_s0, 0  ;;  %p4174_p10 = pnand %p3127_p7, %p722_p8 }
  0x44   : > { %4711 = sst [smem:[#allocation32_spill]] %s4710_s12  ;;  %s3944_s11 = smov [#allocation7]  }
  0x45   : > { %s4712_s7 = scalar_select %p4174_p10, 1, 0 }
  0x46   : > { %s761_s5 = sshll.u32 %s3944_s11, 4  ;;  %p3496_p11 = pneg %p4174_p10  ;;  %s762_s5 = int_to_ptr.vmem [resolvable:$true] %s761_s5 }
  0x47   : > { %s3945_s26 = smov [#allocation4]   ;;  %s3946_s18 = smov [#allocation9]  }
  0x48   : > { %s747_s4 = sshll.u32 %s3945_s26, 4  ;;  %p4182_p12 = pnand %p4676_p9, %p3496_p11  ;;  %s4186_s4 = int_to_ptr.vmem [resolvable:$true] %s747_s4 }
  0x49   : > { %s772_s22 = sshll.u32 %s3946_s18, 4  ;;  %s3758_s12 = scalar_lea.hbm %s4012_s8, 16  ;;  %s4188_s22 = int_to_ptr.vmem [resolvable:$true] %s772_s22 }
  0x4a   : > { %p3759_p13 = scmp.ne.s32.totalorder %s4012_s8, %s3758_s12  ;;  %p4194_p0 = pneg %p4182_p12 }
  0x4b   : > { %p3765_p3 = scmp.lt.u32.totalorder %s3758_s12, %s4012_s8 }
  0x4c   : > { %p3761_p1 = pnand %p4194_p0, %p3759_p13 }
  0x4e   : > { %p3762_p2 = pneg %p3761_p1 }
  0x50   : > { %p3767_p4 = pnand %p3765_p3, %p3762_p2 }
  0x52   : > { %3770 = shalt.err (!%p3767_p4)
}
  0x53   : > { %s3771_s26 = scalar_lea.vmem %s762_s5, 16  ;;  %s3778_s18 = scalar_lea.vmem %s762_s5, 32 }
  0x54   : > { %p3772_p7 = scmp.ne.s32.totalorder %s762_s5, %s3771_s26  ;;  %p3779_p9 = scmp.lt.s32.totalorder %s762_s5, %s762_s5 }
  0x55   : > { %p3780_p6 = scmp.lt.s32.totalorder %s3778_s18, %s3771_s26 }
  0x56   : > { %p3774_p8 = pnand %p3772_p7, %p4194_p0 }
  0x57   : > { %p3781_p5 = por %p3780_p6, %p3779_p9 }
  0x58   : > { %p3775_p11 = pneg %p3774_p8 }
  0x5a   : > { %p3782_p10 = pnand %p3781_p5, %p3775_p11 }
  0x5c   : > { %3785 = shalt.err (!%p3782_p10)
}
  0x5d   : > { %3502 = dma.hbm_to_vmem [thread:$0]  (!%p4182_p12), %s4012_s8, 16, %s762_s5, [#allocation8]  }
  0x5e   : > { %s3786_s12 = scalar_lea.hbm %s4002_s29, 16 }
  0x5f   : > { %p3787_p13 = scmp.ne.s32.totalorder %s4002_s29, %s3786_s12  ;;  %p3793_p3 = scmp.lt.u32.totalorder %s3786_s12, %s4002_s29 }
  0x61   : > { %p3789_p1 = pnand %p3787_p13, %p4194_p0 }
  0x63   : > { %p3790_p2 = pneg %p3789_p1 }
  0x65   : > { %p3795_p4 = pnand %p3793_p3, %p3790_p2 }
  0x67   : > { %3798 = shalt.err (!%p3795_p4)
}
  0x68   : > { %s3799_s26 = scalar_lea.vmem %s4186_s4, 16  ;;  %s3806_s18 = scalar_lea.vmem %s4186_s4, 32 }
  0x69   : > { %p3800_p5 = scmp.ne.s32.totalorder %s4186_s4, %s3799_s26  ;;  %p3807_p10 = scmp.lt.s32.totalorder %s4186_s4, %s4186_s4 }
  0x6a   : > { %p3808_p7 = scmp.lt.s32.totalorder %s3806_s18, %s3799_s26 }
  0x6b   : > { %p3802_p6 = pnand %p3800_p5, %p4194_p0 }
  0x6c   : > { %p3809_p8 = por %p3808_p7, %p3807_p10 }
  0x6d   : > { %p3803_p9 = pneg %p3802_p6 }
  0x6f   : > { %p3810_p11 = pnand %p3809_p8, %p3803_p9 }
  0x71   : > { %3813 = shalt.err (!%p3810_p11)
}
  0x72   : > { %3499 = dma.hbm_to_vmem [thread:$0]  (!%p4182_p12), %s4002_s29, 16, %s4186_s4, [#allocation5]  }
  0x73   : > { %s3814_s5 = scalar_lea.hbm %s4017_s14, 16 }
  0x74   : > { %p3815_p13 = scmp.ne.s32.totalorder %s4017_s14, %s3814_s5  ;;  %p3821_p3 = scmp.lt.u32.totalorder %s3814_s5, %s4017_s14 }
  0x76   : > { %p3817_p1 = pnand %p3815_p13, %p4194_p0 }
  0x78   : > { %p3818_p2 = pneg %p3817_p1 }
  0x7a   : > { %p3823_p4 = pnand %p3821_p3, %p3818_p2 }
  0x7c   : > { %3826 = shalt.err (!%p3823_p4)
}
  0x7d   : > { %s3827_s12 = scalar_lea.vmem %s4188_s22, 16  ;;  %s3834_s26 = scalar_lea.vmem %s4188_s22, 32 }
  0x7e   : > { %p3828_p5 = scmp.ne.s32.totalorder %s4188_s22, %s3827_s12  ;;  %p3835_p10 = scmp.lt.s32.totalorder %s4188_s22, %s4188_s22 }
  0x7f   : > { %p3836_p7 = scmp.lt.s32.totalorder %s3834_s26, %s3827_s12 }
  0x80   : > { %p3830_p6 = pnand %p3828_p5, %p4194_p0 }
  0x81   : > { %p3837_p8 = por %p3836_p7, %p3835_p10 }
  0x82   : > { %p3831_p9 = pneg %p3830_p6 }
  0x84   : > { %p3838_p11 = pnand %p3837_p8, %p3831_p9 }
  0x86   : > { %3841 = shalt.err (!%p3838_p11)
}
  0x87   : > { %3505 = dma.hbm_to_vmem [thread:$0]  (!%p4182_p12), %s4017_s14, 16, %s4188_s22, [#allocation8]  }
  0x88   : > { %p4715_p13 = scmp.ne.s32.totalorder %s4712_s7, 0 }
  0x89   : > { %p4716_p1 = scmp.eq.s32.totalorder (!%p4715_p13), %s4146_s0, 0 }
  0x8a   : > { %853 = sbr.rel (%p4715_p13) target bundleno = 6415 (0x190f), region = 136 }
  0x91   : > { %3887 = dma.done.wait (%p4716_p1), [#allocation5], 16   ;;  %p4717_p0 = pmov %p4716_p1 }
  0x93   : > { %3889 = vsyncadd (%p4717_p0), [#allocation5], 4294967280  ;;  %p4718_p2 = pmov %p4717_p0 }
  0x94   : > { %p4719_p3 = pmov %p4717_p0 }
  0x95   : > { %3891 = dma.done.wait (%p4718_p2), [#allocation8], 32  }
  0x96   : > { %3893 = vsyncadd (%p4719_p3), [#allocation8], 4294967264  ;;  %p936_p12 = scmp.lt.s32.totalorder %s4146_s0, 1  ;;  %v953_v1 = vld [vmem:[%s3982_s13] sm:$0xff]  ;;  %vm957_vm0 = vcmask 261120   ;;  %v954_v4 = vld [vmem:[%s3982_s13 + $0x8] sm:$0xff]  ;;  %v942_v57 = vlaneseq }
  0x97   : > { %v3628_v18 = vld [vmem:[%s3997_s25] sm:$0xff]   ;;  %v3947_v19 = vmov 0.0   ;;  %v3629_v20 = vld [vmem:[%s3997_s25 + $0x8] sm:$0xff]   ;;  %vm3948_vm1 = vmmov 0   ;;  %s3949_s4 = smov 88   ;;  %s3950_s11 = smov 96  }
  0x98   : > { %s937_s22 = scalar_select %p936_p12, %s4146_s0, 1  ;;  %3290 = vmatprep.subr.bf16.mxu1 %v3947_v19  ;;  %3304 = vmatprep.subr.bf16.mxu0 %v3947_v19  ;;  %v3138_v29 = vld [vmem:[%s3987_s17] ss:$0 sm:$0xff]  ;;  %vm1075_vm2 = vcmask 64512   ;;  %v4317_v58 = vshrl.u32 %v942_v57, 7  ;;  %v946_v59 = vand.u32 127, %v942_v57 }
  0x99   : > { %3291 = vmatpush3.bf16.msra.mxu1 %v3628_v18  ;;  %3294 = vmatprep.mubr.msk.bf16.mxu1 %vm3948_vm1, %v3947_v19  ;;  %v3139_v33 = vld [vmem:[%s3992_s21] ss:$0 sm:$0xff]  ;;  %s3951_s18 = smov 120   ;;  %s4680_s5 = smov 112   ;;  %vm1127_vm5 = vcmask 130048   ;;  %vm1601_vm6 = vcmask 195584  }
  0x9a   : > { %s3218_s28 = sshll.u32 %s937_s22, 4  ;;  %3292 = vmatprep.subr.bf16.mxu1 %v3947_v19  ;;  %3306 = vmatprep.mubr.msk.bf16.mxu0 %vm3948_vm1, %v3947_v19  ;;  %v3140_v38 = vld [vmem:[#allocation4] ss:$0 sm:$0xff]  ;;  %s3953_s12 = smov 80   ;;  %v4320_v60 = vadd.s32 8, %v4317_v58  ;;  %vm947_vm3 = vcmp.gt.s32.totalorder %v946_v59, %v4317_v58  ;;  %vm2995_vm9 = vcmask 253952  }
  0x9b   : > { %s940_s7 = scalar_lea.vmem %s3977_s9, %s3218_s28  ;;  %s4679_s26 = smov 104   ;;  %v4325_v62 = vsel %vm947_vm3, -1e+09, %v3947_v19 }
  0x9c   : > { %v951_v0 = vld [vmem:[%s940_s7] sm:$0xff]  ;;  %v952_v2 = vld [vmem:[%s940_s7 + $0x8] sm:$0xff]  ;;  %s3955_s22 = smov 72   ;;  %vm948_vm4 = vcmp.gt.s32.totalorder %v946_v59, %v4320_v60  ;;  %s4687_s28 = smov 64  }
  0x9d   : > { %v4252_v3 = vadd.f32 %v953_v1, %v951_v0  ;;  %v4255_v5 = vadd.f32 %v954_v4, %v952_v2  ;;  %3293 = vmatpush3.bf16.msra.mxu1 %v3629_v20  ;;  %v4328_v2 = vsel %vm948_vm4, -1e+09, %v3947_v19  ;;  %s4686_s7 = smov 48   ;;  %s4742_s1 = sld [smem:[#allocation28_spill]] }
  0x9e   : > { %3298 = vmatprep.subr.bf16.mxu1 %v3947_v19  ;;  %p4743_p5 = scmp.ne.s32.totalorder %s4709_s2, 0 }
  0x9f   : > { %v958_v6 = vsel %vm957_vm0, %v4252_v3, 0.0  ;;  %v961_v7 = vsel %vm957_vm0, %v4255_v5, 0.0 }
  0xa0   : > { %959 = vadd.xlane.f32.xlu0 %v958_v6 }
  0xa4   : > { %962 = vadd.xlane.f32.xlu0 %v961_v7 }
 0x12d   : > { %v960_v8 = vpop.xlane.xlu0 %959 }
 0x12e   : > { %v965_v9 = vmul.f32 0.03125, %v960_v8 }
 0x130   : > { %v967_v10 = vsub.f32 %v4252_v3, %v965_v9 }
 0x131   : > { %v963_v11 = vpop.xlane.xlu0 %962 }
 0x132   : > { %v966_v12 = vmul.f32 0.03125, %v963_v11  ;;  %v969_v13 = vmul.f32 %v967_v10, %v967_v10 }
 0x134   : > { %v968_v14 = vsub.f32 %v4255_v5, %v966_v12  ;;  %v971_v15 = vsel %vm957_vm0, %v969_v13, 0.0 }
 0x135   : > { %972 = vadd.xlane.f32.xlu1 %v971_v15 }
 0x136   : > { %v970_v16 = vmul.f32 %v968_v14, %v968_v14 }
 0x138   : > { %v974_v17 = vsel %vm957_vm0, %v970_v16, 0.0 }
 0x139   : > { %975 = vadd.xlane.f32.xlu1 %v974_v17 }
 0x1c2   : > { %v973_v21 = vpop.xlane.xlu1 %972 }
 0x1c3   : > { %v977_v22 = vmul.f32 0.03125, %v973_v21 }
 0x1c5   : > { %v979_v23 = vadd.f32 1e-05, %v977_v22 }
 0x1c6   : > { %v976_v24 = vpop.xlane.xlu1 %975 }
 0x1c7   : > { %3658 = vrsqrt.f32 %v979_v23  ;;  %v978_v25 = vmul.f32 0.03125, %v976_v24 }
 0x1c9   : > { %v980_v26 = vadd.f32 1e-05, %v978_v25 }
 0x1cb   : > { %3660 = vrsqrt.f32 %v980_v26 }
 0x1d1   : > { %v3659_v27 = vpop.eup %3658 }
 0x1d2   : > { %v983_v28 = vmul.f32 %v3659_v27, %v967_v10 }
 0x1d4   : > { %v992_v32 = vmul.f32 %v3138_v29, %v983_v28 }
 0x1d5   : > { %v3661_v30 = vpop.eup %3660 }
 0x1d6   : > { %v984_v31 = vmul.f32 %v3661_v30, %v968_v14  ;;  %v1001_v35 = vadd.f32 %v3139_v33, %v992_v32 }
 0x1d8   : > { %v993_v34 = vmul.f32 %v3138_v29, %v984_v31 }
 0x1da   : > { %v1002_v36 = vadd.f32 %v3139_v33, %v993_v34 }
 0x1dc   : > { %v1003_v37 = vpack.c.bf16 %v1002_v36, %v1001_v35 }
 0x1de   : > { %3295 = vmatmul.mubr.msk.bf16.vlgmr.msra.gmra.mrb[0].mxu1 %vm957_vm0, %v1003_v37 }
 0x1df   : > { %3300 = vmatprep.mubr.msk.bf16.mxu1 %vm3948_vm1, %v3947_v19 }
 0x2b1   : > { %v1064_v39 = vpop.f32.mrb[0].mxu1 }
 0x2b2   : > { %v3296_v40 = vpop.f32.mrb[1].mxu1  ;;  %v1065_v42 = vadd.f32 %v3140_v38, %v1064_v39 }
 0x2b3   : > { %v1067_v41 = vpop.f32.mrb[2].mxu1 }
 0x2b4   : > { %v1068_v43 = vadd.f32 %v3140_v38, %v1067_v41  ;;  %v3297_v44 = vpop.f32.mrb[3].mxu1 }
 0x2b6   : > { %v4280_v45 = vpack.c.bf16 %v1068_v43, %v1065_v42 }
 0x2b8   : > { %1200 = vrot.lane.b32.xlu1 %v4280_v45, %s3949_s4  ;;  %1073 = vrot.lane.b32.xlu0 %v4280_v45, %s3950_s11 }
 0x2bc   : > { %1198 = vrot.lane.b32.xlu1 %v4280_v45, %s3951_s18  ;;  %1323 = vrot.lane.b32.xlu0 %v4280_v45, %s4680_s5  ;;  %s4682_s5 = smov 56  }
 0x2c0   : > { %1325 = vrot.lane.b32.xlu1 %v4280_v45, %s3953_s12  ;;  %1448 = vrot.lane.b32.xlu0 %v4280_v45, %s4679_s26  ;;  %s4681_s26 = smov 40  }
 0x2c4   : > { %1450 = vrot.lane.b32.xlu1 %v4280_v45, %s3955_s22 }
 0x32a   : > { %v1074_v46 = vpop.permute.xlu0 %1073  ;;  %v1201_v48 = vpop.permute.xlu1 %1200 }
 0x32b   : > { %v1080_v47 = vsel %vm1075_vm2, %v1074_v46, 0  ;;  %v1206_v50 = vsel %vm1075_vm2, %v1201_v48, 0 }
 0x32c   : > { %3299 = vmatpush3.bf16.xpose.msra.mxu1 %v1080_v47 }
 0x32d   : > { %3310 = vmatprep.subr.bf16.mxu1 %v3947_v19 }
 0x32e   : > { %v1199_v49 = vpop.permute.xlu1 %1198  ;;  %v1324_v54 = vpop.permute.xlu0 %1323 }
 0x332   : > { %v1326_v51 = vpop.permute.xlu1 %1325  ;;  %v1449_v56 = vpop.permute.xlu0 %1448 }
 0x333   : > { %3301 = vmatmul.mubr.msk.bf16.vlgmr.msra.gmra.mrb[4].mxu1 %vm1075_vm2, %v4280_v45  ;;  %v1331_v52 = vsel %vm1075_vm2, %v1326_v51, 0 }
 0x334   : > { %3311 = vmatpush3.bf16.xpose.msra.mxu1 %v1206_v50  ;;  %3312 = vmatprep.mubr.msk.bf16.mxu1 %vm3948_vm1, %v3947_v19 }
 0x335   : > { %3322 = vmatprep.subr.bf16.mxu1 %v3947_v19 }
 0x336   : > { %v1451_v53 = vpop.permute.xlu1 %1450 }
 0x337   : > { %v1456_v55 = vsel %vm1075_vm2, %v1451_v53, 0 }
 0x33b   : > { %3313 = vmatmul.mubr.msk.bf16.vlgmr.msra.gmra.mrb[8].mxu1 %vm1075_vm2, %v1199_v49 }
 0x33c   : > { %3323 = vmatpush3.bf16.xpose.msra.mxu1 %v1331_v52  ;;  %3324 = vmatprep.mubr.msk.bf16.mxu1 %vm3948_vm1, %v3947_v19 }
 0x33d   : > { %3334 = vmatprep.subr.bf16.mxu1 %v3947_v19 }
 0x343   : > { %3325 = vmatmul.mubr.msk.bf16.vlgmr.msra.gmra.mrb[12].mxu1 %vm1075_vm2, %v1324_v54 }
 0x344   : > { %3335 = vmatpush3.bf16.xpose.msra.mxu1 %v1456_v55  ;;  %3336 = vmatprep.mubr.msk.bf16.mxu1 %vm3948_vm1, %v3947_v19 }
 0x345   : > { %3346 = vmatprep.subr.bf16.mxu1 %v3947_v19 }
 0x34b   : > { %3337 = vmatmul.mubr.msk.bf16.vlgmr.msra.gmra.mrb[16].mxu1 %vm1075_vm2, %v1449_v56 }
 0x34c   : > { %3350 = vmatprep.mubr.msk.bf16.mxu1 %vm3948_vm1, %v3947_v19 }
 0x406   : > { %v1116_v61 = vpop.f32.mrb[4].mxu1 }
 0x407   : > { %v1123_v63 = vmul.f32 0.35355338, %v1116_v61  ;;  %v3302_v0 = vpop.f32.mrb[5].mxu1 }
 0x408   : > { %v1119_v1 = vpop.f32.mrb[6].mxu1 }
 0x409   : > { %v1124_v4 = vmul.f32 0.35355338, %v1119_v1  ;;  %v3303_v6 = vpop.f32.mrb[7].mxu1  ;;  %v1125_v7 = vadd.f32 %v1123_v63, %v4325_v62 }
 0x40b   : > { %v1128_v8 = vsel %vm1127_vm5, %v1125_v7, -inf  ;;  %v1126_v9 = vadd.f32 %v1124_v4, %v4328_v2 }
 0x40c   : > { %1129 = vmax.xlane.f32.xlu1 %v1128_v8 }
 0x40d   : > { %v1131_v10 = vsel %vm1127_vm5, %v1126_v9, -inf }
 0x40e   : > { %1132 = vmax.xlane.f32.xlu0 %v1131_v10  ;;  %v1242_v11 = vpop.f32.mrb[8].mxu1 }
 0x40f   : > { %v1249_v12 = vmul.f32 0.35355338, %v1242_v11  ;;  %v3314_v13 = vpop.f32.mrb[9].mxu1 }
 0x410   : > { %v1245_v14 = vpop.f32.mrb[10].mxu1 }
 0x411   : > { %v1250_v15 = vmul.f32 0.35355338, %v1245_v14  ;;  %v3315_v16 = vpop.f32.mrb[11].mxu1  ;;  %v1251_v17 = vadd.f32 %v1249_v12, %v4325_v62 }
 0x413   : > { %v1253_v18 = vsel %vm1127_vm5, %v1251_v17, -inf  ;;  %v1252_v20 = vadd.f32 %v1250_v15, %v4328_v2 }
 0x414   : > { %1254 = vmax.xlane.f32.xlu0 %v1253_v18 }
 0x415   : > { %v1256_v24 = vsel %vm1127_vm5, %v1252_v20, -inf }
 0x416   : > { %v1367_v21 = vpop.f32.mrb[12].mxu1 }
 0x417   : > { %v1374_v22 = vmul.f32 0.35355338, %v1367_v21  ;;  %v3326_v23 = vpop.f32.mrb[13].mxu1 }
 0x418   : > { %1257 = vmax.xlane.f32.xlu0 %v1256_v24  ;;  %v1370_v25 = vpop.f32.mrb[14].mxu1 }
 0x419   : > { %v1375_v26 = vmul.f32 0.35355338, %v1370_v25  ;;  %v3327_v27 = vpop.f32.mrb[15].mxu1  ;;  %v1376_v28 = vadd.f32 %v1374_v22, %v4325_v62 }
 0x41b   : > { %v1378_v29 = vsel %vm1127_vm5, %v1376_v28, -inf  ;;  %v1377_v30 = vadd.f32 %v1375_v26, %v4328_v2 }
 0x41c   : > { %1379 = vmax.xlane.f32.xlu1 %v1378_v29 }
 0x41d   : > { %v1381_v31 = vsel %vm1127_vm5, %v1377_v30, -inf }
 0x41e   : > { %1382 = vmax.xlane.f32.xlu0 %v1381_v31  ;;  %v1492_v32 = vpop.f32.mrb[16].mxu1 }
 0x41f   : > { %v1499_v33 = vmul.f32 0.35355338, %v1492_v32  ;;  %v3338_v34 = vpop.f32.mrb[17].mxu1 }
 0x420   : > { %v1495_v35 = vpop.f32.mrb[18].mxu1 }
 0x421   : > { %v1500_v36 = vmul.f32 0.35355338, %v1495_v35  ;;  %v3339_v37 = vpop.f32.mrb[19].mxu1  ;;  %v1501_v38 = vadd.f32 %v1499_v33, %v4325_v62 }
 0x423   : > { %v1503_v39 = vsel %vm1127_vm5, %v1501_v38, -inf  ;;  %v1502_v40 = vadd.f32 %v1500_v36, %v4328_v2 }
 0x424   : > { %1504 = vmax.xlane.f32.xlu1 %v1503_v39 }
 0x425   : > { %v1506_v41 = vsel %vm1127_vm5, %v1502_v40, -inf }
 0x426   : > { %1507 = vmax.xlane.f32.xlu0 %v1506_v41 }
 0x435   : > { %1151 = vrot.lane.b32.xlu1 %v4280_v45, %s4687_s28  ;;  %s4724_s28 = sld [smem:[#allocation19_spill]] }
 0x499   : > { %v1130_v42 = vpop.xlane.xlu1 %1129 }
 0x49a   : > { %v1134_v43 = vsub.f32 %v1125_v7, %v1130_v42 }
 0x49b   : > { %v1133_v44 = vpop.xlane.xlu0 %1132 }
 0x49c   : > { %v1136_v46 = vmul.f32 1.442695, %v1134_v43  ;;  %v1135_v47 = vsub.f32 %v1126_v9, %v1133_v44 }
 0x49e   : > { %3662 = vpow2.f32 %v1136_v46  ;;  %v1138_v48 = vmul.f32 1.442695, %v1135_v47 }
 0x4a0   : > { %3664 = vpow2.f32 %v1138_v48 }
 0x4a1   : > { %v1255_v49 = vpop.xlane.xlu0 %1254 }
 0x4a2   : > { %v1259_v50 = vsub.f32 %v1251_v17, %v1255_v49 }
 0x4a4   : > { %v1261_v51 = vmul.f32 1.442695, %v1259_v50 }
 0x4a5   : > { %v1258_v52 = vpop.xlane.xlu0 %1257 }
 0x4a6   : > { %3666 = vpow2.f32 %v1261_v51  ;;  %v1260_v53 = vsub.f32 %v1252_v20, %v1258_v52 }
 0x4a8   : > { %v3663_v54 = vpop.eup %3662  ;;  %v1263_v55 = vmul.f32 1.442695, %v1260_v53 }
 0x4a9   : > { %v1380_v56 = vpop.xlane.xlu1 %1379  ;;  %v1140_v57 = vsel %vm1127_vm5, %v3663_v54, 0.0 }
 0x4aa   : > { %v3665_v59 = vpop.eup %3664  ;;  %3668 = vpow2.f32 %v1263_v55  ;;  %v1384_v61 = vsub.f32 %v1376_v28, %v1380_v56  ;;  %1141 = vadd.xlane.f32.xlu1 %v1140_v57 }
 0x4ab   : > { %v1383_v63 = vpop.xlane.xlu0 %1382  ;;  %v1143_v0 = vsel %vm1127_vm5, %v3665_v59, 0.0 }
 0x4ac   : > { %v1386_v1 = vmul.f32 1.442695, %v1384_v61  ;;  %v1385_v4 = vsub.f32 %v1377_v30, %v1383_v63  ;;  %1144 = vadd.xlane.f32.xlu0 %v1143_v0 }
 0x4ae   : > { %3670 = vpow2.f32 %v1386_v1  ;;  %v1388_v6 = vmul.f32 1.442695, %v1385_v4 }
 0x4b0   : > { %v3667_v7 = vpop.eup %3666  ;;  %3672 = vpow2.f32 %v1388_v6 }
 0x4b1   : > { %v1505_v8 = vpop.xlane.xlu1 %1504  ;;  %v1265_v9 = vsel %vm1127_vm5, %v3667_v7, 0.0 }
 0x4b2   : > { %v1509_v10 = vsub.f32 %v1501_v38, %v1505_v8  ;;  %1266 = vadd.xlane.f32.xlu1 %v1265_v9 }
 0x4b3   : > { %v1508_v11 = vpop.xlane.xlu0 %1507 }
 0x4b4   : > { %v3669_v12 = vpop.eup %3668  ;;  %v1511_v13 = vmul.f32 1.442695, %v1509_v10  ;;  %v1510_v14 = vsub.f32 %v1502_v40, %v1508_v11 }
 0x4b5   : > { %v1152_v15 = vpop.permute.xlu1 %1151  ;;  %v1268_v16 = vsel %vm1127_vm5, %v3669_v12, 0.0 }
 0x4b6   : > { %3674 = vpow2.f32 %v1511_v13  ;;  %v1513_v17 = vmul.f32 1.442695, %v1510_v14  ;;  %3305 = vmatpush3.bf16.msra.mxu0 %v1152_v15  ;;  %1269 = vadd.xlane.f32.xlu0 %v1268_v16 }
 0x4b7   : > { %3316 = vmatprep.subr.bf16.mxu0 %v3947_v19 }
 0x4b8   : > { %v3671_v18 = vpop.eup %3670  ;;  %3676 = vpow2.f32 %v1513_v17 }
 0x4b9   : > { %v1390_v20 = vsel %vm1127_vm5, %v3671_v18, 0.0 }
 0x4ba   : > { %v3673_v21 = vpop.eup %3672  ;;  %1391 = vadd.xlane.f32.xlu1 %v1390_v20 }
 0x4bb   : > { %v1393_v22 = vsel %vm1127_vm5, %v3673_v21, 0.0 }
 0x4bc   : > { %1394 = vadd.xlane.f32.xlu0 %v1393_v22 }
 0x4c0   : > { %v3675_v23 = vpop.eup %3674 }
 0x4c1   : > { %v1515_v24 = vsel %vm1127_vm5, %v3675_v23, 0.0 }
 0x4c2   : > { %v3677_v25 = vpop.eup %3676  ;;  %1516 = vadd.xlane.f32.xlu1 %v1515_v24 }
 0x4c3   : > { %v1518_v26 = vsel %vm1127_vm5, %v3677_v25, 0.0 }
 0x4c4   : > { %1519 = vadd.xlane.f32.xlu0 %v1518_v26 }
 0x4d3   : > { %1401 = vrot.lane.b32.xlu1 %v4280_v45, %s4686_s7  ;;  %s4723_s7 = sld [smem:[#allocation17_spill]] }
 0x4d7   : > { %1526 = vrot.lane.b32.xlu1 %v4280_v45, %s4681_s26  ;;  %s4683_s26 = smov 8  }
 0x4da   : > { %1276 = vrot.lane.b32.xlu0 %v4280_v45, %s4682_s5  ;;  %s4685_s5 = smov 16  }
 0x537   : > { %v1142_v27 = vpop.xlane.xlu1 %1141 }
 0x538   : > { %3678 = vrcp.f32 %v1142_v27 }
 0x539   : > { %v1145_v28 = vpop.xlane.xlu0 %1144 }
 0x53a   : > { %3680 = vrcp.f32 %v1145_v28 }
 0x53f   : > { %v1267_v32 = vpop.xlane.xlu1 %1266 }
 0x542   : > { %v3679_v29 = vpop.eup %3678 }
 0x543   : > { %v1270_v30 = vpop.xlane.xlu0 %1269  ;;  %v1148_v33 = vmul.f32 %v3679_v29, %v3663_v54 }
 0x544   : > { %v3681_v31 = vpop.eup %3680  ;;  %3682 = vrcp.f32 %v1270_v30 }
 0x545   : > { %v1149_v34 = vmul.f32 %v3681_v31, %v3665_v59  ;;  %3684 = vrcp.f32 %v1267_v32 }
 0x547   : > { %v1150_v35 = vpack.c.bf16 %v1149_v34, %v1148_v33  ;;  %v1392_v45 = vpop.xlane.xlu1 %1391 }
 0x549   : > { %3307 = vmatmul.mubr.msk.bf16.vlgmr.msra.gmra.mrb[0].mxu0 %vm1127_vm5, %v1150_v35  ;;  %v1395_v36 = vpop.xlane.xlu0 %1394 }
 0x54a   : > { %3318 = vmatprep.mubr.msk.bf16.mxu0 %vm3948_vm1, %v3947_v19  ;;  %3686 = vrcp.f32 %v1395_v36 }
 0x54b   : > { %3688 = vrcp.f32 %v1392_v45 }
 0x54e   : > { %v3683_v37 = vpop.eup %3682 }
 0x54f   : > { %v3685_v39 = vpop.eup %3684  ;;  %v1274_v40 = vmul.f32 %v3683_v37, %v3669_v12  ;;  %v1517_v41 = vpop.xlane.xlu1 %1516  ;;  %v3631_v12 = vld [vmem:[%s4705_s3 + $0x8] sm:$0xff]   ;;  %v3152_v37 = vld [vmem:[#allocation7] ss:$0 sm:$0xff] }
 0x550   : > { %v1273_v42 = vmul.f32 %v3685_v39, %v3667_v7  ;;  %v3630_v7 = vld [vmem:[%s4705_s3] sm:$0xff]  }
 0x551   : > { %v1520_v38 = vpop.xlane.xlu0 %1519  ;;  %3347 = vmatpush3.bf16.msra.mxu1 %v3630_v7 }
 0x552   : > { %3690 = vrcp.f32 %v1520_v38  ;;  %v1275_v44 = vpack.c.bf16 %v1274_v40, %v1273_v42  ;;  %3348 = vmatprep.subr.bf16.mxu1 %v3947_v19 }
 0x553   : > { %3692 = vrcp.f32 %v1517_v41  ;;  %v1402_v47 = vpop.permute.xlu1 %1401 }
 0x554   : > { %v3687_v46 = vpop.eup %3686 }
 0x555   : > { %v1277_v43 = vpop.permute.xlu0 %1276  ;;  %v3689_v48 = vpop.eup %3688  ;;  %v1399_v49 = vmul.f32 %v3687_v46, %v3673_v21  ;;  %3349 = vmatpush3.bf16.msra.mxu1 %v3631_v12 }
 0x556   : > { %3317 = vmatpush3.bf16.msra.mxu0 %v1277_v43  ;;  %v1398_v50 = vmul.f32 %v3689_v48, %v3671_v18  ;;  %3362 = vmatprep.subr.bf16.mxu1 %v3947_v19 }
 0x557   : > { %3328 = vmatprep.subr.bf16.mxu0 %v3947_v19  ;;  %v1527_v53 = vpop.permute.xlu1 %1526 }
 0x558   : > { %v1400_v51 = vpack.c.bf16 %v1399_v49, %v1398_v50 }
 0x559   : > { %3319 = vmatmul.mubr.msk.bf16.vlgmr.msra.gmra.mrb[4].mxu0 %vm1127_vm5, %v1275_v44 }
 0x55a   : > { %3329 = vmatpush3.bf16.msra.mxu0 %v1402_v47  ;;  %3330 = vmatprep.mubr.msk.bf16.mxu0 %vm3948_vm1, %v3947_v19 }
 0x55b   : > { %3340 = vmatprep.subr.bf16.mxu0 %v3947_v19 }
 0x55c   : > { %v3691_v52 = vpop.eup %3690 }
 0x55d   : > { %v3693_v54 = vpop.eup %3692  ;;  %v1524_v55 = vmul.f32 %v3691_v52, %v3677_v25 }
 0x55e   : > { %v1523_v56 = vmul.f32 %v3693_v54, %v3675_v23 }
 0x560   : > { %v1525_v57 = vpack.c.bf16 %v1524_v55, %v1523_v56 }
 0x561   : > { %3331 = vmatmul.mubr.msk.bf16.vlgmr.msra.gmra.mrb[8].mxu0 %vm1127_vm5, %v1400_v51 }
 0x562   : > { %3341 = vmatpush3.bf16.msra.mxu0 %v1527_v53  ;;  %3342 = vmatprep.mubr.msk.bf16.mxu0 %vm3948_vm1, %v3947_v19 }
 0x563   : > { %3354 = vmatprep.subr.bf16.mxu0 %v3947_v19 }
 0x569   : > { %3343 = vmatmul.mubr.msk.bf16.vlgmr.msra.gmra.mrb[12].mxu0 %vm1127_vm5, %v1525_v57  ;;  %v3632_v57 = vld [vmem:[%s4027_s24] sm:$0xff]  }
 0x56a   : > { %3358 = vmatprep.mubr.msk.bf16.mxu0 %vm3948_vm1, %v3947_v19  ;;  %3355 = vmatpush3.bf16.msra.mxu0 %v3632_v57 }
 0x56b   : > { %3356 = vmatprep.subr.bf16.mxu0 %v3947_v19 }
 0x61c   : > { %v1191_v59 = vpop.f32.mrb[0].mxu0 }
 0x61d   : > { %v3308_v61 = vpop.f32.mrb[1].mxu0 }
 0x61e   : > { %v1194_v63 = vpop.f32.mrb[2].mxu0 }
 0x61f   : > { %v3309_v0 = vpop.f32.mrb[3].mxu0 }
 0x62c   : > { %v1316_v1 = vpop.f32.mrb[4].mxu0 }
 0x62d   : > { %v3320_v4 = vpop.f32.mrb[5].mxu0 }
 0x62e   : > { %v1319_v6 = vpop.f32.mrb[6].mxu0 }
 0x62f   : > { %v3598_v8 = vpack.i.bf16 %v1319_v6, %v1316_v1  ;;  %v3321_v9 = vpop.f32.mrb[7].mxu0 }
 0x630   : > { %v3156_v9 = vld [vmem:[#allocation9] ss:$0 sm:$0xff] }
 0x631   : > { %3599 = vrot.lane.b32.xlu1 %v3598_v8, %s4683_s26  ;;  %s4684_s26 = smov 24  }
 0x634   : > { %v1441_v10 = vpop.f32.mrb[8].mxu0 }
 0x635   : > { %v3332_v11 = vpop.f32.mrb[9].mxu0 }
 0x636   : > { %v1444_v13 = vpop.f32.mrb[10].mxu0 }
 0x637   : > { %v3603_v14 = vpack.i.bf16 %v1444_v13, %v1441_v10  ;;  %v3333_v15 = vpop.f32.mrb[11].mxu0  ;;  %v3157_v13 = vld [vmem:[%s4022_s19] ss:$0 sm:$0xff] }
 0x639   : > { %3604 = vrot.lane.b32.xlu0 %v3603_v14, %s4685_s5  ;;  %s4721_s5 = sld [smem:[#allocation18_spill]] }
 0x63c   : > { %v1566_v16 = vpop.f32.mrb[12].mxu0 }
 0x63d   : > { %v3344_v17 = vpop.f32.mrb[13].mxu0 }
 0x63e   : > { %v1569_v18 = vpop.f32.mrb[14].mxu0 }
 0x63f   : > { %v3608_v20 = vpack.i.bf16 %v1569_v18, %v1566_v16  ;;  %v3345_v21 = vpop.f32.mrb[15].mxu0  ;;  %v3634_v18 = vld [vmem:[%s4037_s6] sm:$0xff]  }
 0x640   : > { %v3636_v21 = vld [vmem:[%s4037_s6 + $0x10] sm:$0xff]  }
 0x641   : > { %3609 = vrot.lane.b32.xlu1 %v3608_v20, %s4684_s26  ;;  %v3635_v20 = vld [vmem:[%s4037_s6 + $0x8] sm:$0xff]   ;;  %s4720_s26 = sld [smem:[#allocation15_spill]] }
 0x6a3   : > { %v3600_v22 = vpop.permute.xlu1 %3599 }
 0x6a4   : > { %v3602_v24 = vunpack.i.h.bf16 %v3600_v22  ;;  %v3601_v25 = vunpack.i.l.bf16 %v3600_v22  ;;  %v3637_v22 = vld [vmem:[%s4037_s6 + $0x18] sm:$0xff]  }
 0x6a6   : > { %v1598_v29 = vsel %vm1075_vm2, %v1194_v63, %v3602_v24  ;;  %v1597_v30 = vsel %vm1075_vm2, %v1191_v59, %v3601_v25  ;;  %v3633_v59 = vld [vmem:[%s4027_s24 + $0x8] sm:$0xff]   ;;  %v3640_v25 = vld [vmem:[%s4037_s6 + $0x30] sm:$0xff]  }
 0x6a7   : > { %3357 = vmatpush3.bf16.msra.mxu0 %v3633_v59  ;;  %v3639_v24 = vld [vmem:[%s4037_s6 + $0x28] sm:$0xff]  }
 0x6a8   : > { %3382 = vmatprep.subr.bf16.mxu0 %v3947_v19 }
 0x6ab   : > { %v3605_v23 = vpop.permute.xlu0 %3604 }
 0x6ac   : > { %v3607_v26 = vunpack.i.h.bf16 %v3605_v23  ;;  %v3606_v27 = vunpack.i.l.bf16 %v3605_v23  ;;  %v3638_v23 = vld [vmem:[%s4037_s6 + $0x20] sm:$0xff]  }
 0x6ae   : > { %v1600_v33 = vsel %vm1127_vm5, %v1598_v29, %v3607_v26  ;;  %v1599_v34 = vsel %vm1127_vm5, %v1597_v30, %v3606_v27  ;;  %v3641_v26 = vld [vmem:[%s4037_s6 + $0x38] sm:$0xff]   ;;  %v3158_v27 = vld [vmem:[%s4032_s30] ss:$0 sm:$0xff] }
 0x6b3   : > { %v3610_v28 = vpop.permute.xlu1 %3609 }
 0x6b4   : > { %v3612_v31 = vunpack.i.h.bf16 %v3610_v28  ;;  %v3611_v32 = vunpack.i.l.bf16 %v3610_v28 }
 0x6b6   : > { %v1603_v35 = vsel %vm1601_vm6, %v1600_v33, %v3612_v31  ;;  %v1602_v36 = vsel %vm1601_vm6, %v1599_v34, %v3611_v32 }
 0x6b7   : > { %v1604_v45 = vpack.c.bf16 %v1603_v35, %v1602_v36 }
 0x6b9   : > { %3351 = vmatmul.mubr.msk.bf16.vlgmr.msra.gmra.mrb[20].mxu1 %vm957_vm0, %v1604_v45 }
 0x6ba   : > { %3378 = vmatprep.mubr.msk.bf16.mxu1 %vm3948_vm1, %v3947_v19  ;;  %3363 = vmatpush3.bf16.msra.mxu1 %v3634_v18 }
 0x6bb   : > { %3364 = vmatprep.subr.bf16.mxu1 %v3947_v19 }
 0x6be   : > { %3365 = vmatpush3.bf16.msra.mxu1 %v3635_v20 }
 0x6bf   : > { %3366 = vmatprep.subr.bf16.mxu1 %v3947_v19 }
 0x6c2   : > { %3367 = vmatpush3.bf16.msra.mxu1 %v3636_v21 }
 0x6c3   : > { %3368 = vmatprep.subr.bf16.mxu1 %v3947_v19 }
 0x6c6   : > { %3369 = vmatpush3.bf16.msra.mxu1 %v3637_v22 }
 0x6c7   : > { %3370 = vmatprep.subr.bf16.mxu1 %v3947_v19 }
 0x6ca   : > { %3371 = vmatpush3.bf16.msra.mxu1 %v3638_v23  ;;  %v3174_v23 = vld [vmem:[%s4723_s7] ss:$0 sm:$0xff]  ;;  %s4731_s7 = sld [smem:[#allocation20_spill]] }
 0x6cb   : > { %3372 = vmatprep.subr.bf16.mxu1 %v3947_v19 }
 0x6ce   : > { %3373 = vmatpush3.bf16.msra.mxu1 %v3639_v24 }
 0x6cf   : > { %3374 = vmatprep.subr.bf16.mxu1 %v3947_v19 }
 0x6d2   : > { %3375 = vmatpush3.bf16.msra.mxu1 %v3640_v25 }
 0x6d3   : > { %3376 = vmatprep.subr.bf16.mxu1 %v3947_v19 }
 0x6d6   : > { %3377 = vmatpush3.bf16.msra.mxu1 %v3641_v26 }
 0x6d7   : > { %3408 = vmatprep.subr.bf16.mxu1 %v3947_v19 }
 0x78c   : > { %v1665_v38 = vpop.f32.mrb[20].mxu1 }
 0x78d   : > { %v1666_v39 = vadd.f32 %v3152_v37, %v1665_v38  ;;  %v3352_v40 = vpop.f32.mrb[21].mxu1 }
 0x78e   : > { %v1668_v41 = vpop.f32.mrb[22].mxu1 }
 0x78f   : > { %v4395_v42 = vadd.f32 %v1666_v39, %v4252_v3  ;;  %v1669_v43 = vadd.f32 %v3152_v37, %v1668_v41  ;;  %v3353_v44 = vpop.f32.mrb[23].mxu1 }
 0x791   : > { %v4398_v46 = vadd.f32 %v1669_v43, %v4255_v5  ;;  %v1674_v47 = vsel %vm957_vm0, %v4395_v42, 0.0 }
 0x792   : > { %1675 = vadd.xlane.f32.xlu0 %v1674_v47 }
 0x793   : > { %v1677_v48 = vsel %vm957_vm0, %v4398_v46, 0.0 }
 0x794   : > { %1678 = vadd.xlane.f32.xlu1 %v1677_v48 }
 0x81f   : > { %v1676_v49 = vpop.xlane.xlu0 %1675 }
 0x820   : > { %v1680_v50 = vmul.f32 0.03125, %v1676_v49  ;;  %v3164_v49 = vld [vmem:[%s4720_s26] ss:$0 sm:$0xff]  ;;  %s4722_s26 = sld [smem:[#allocation16_spill]] }
 0x821   : > { %v1679_v51 = vpop.xlane.xlu1 %1678 }
 0x822   : > { %v1682_v3 = vsub.f32 %v4395_v42, %v1680_v50  ;;  %v1681_v52 = vmul.f32 0.03125, %v1679_v51 }
 0x824   : > { %v1683_v53 = vsub.f32 %v4398_v46, %v1681_v52  ;;  %v1684_v5 = vmul.f32 %v1682_v3, %v1682_v3 }
 0x826   : > { %v1686_v54 = vsel %vm957_vm0, %v1684_v5, 0.0  ;;  %v1685_v55 = vmul.f32 %v1683_v53, %v1683_v53 }
 0x827   : > { %1687 = vadd.xlane.f32.xlu0 %v1686_v54 }
 0x828   : > { %v1689_v56 = vsel %vm957_vm0, %v1685_v55, 0.0 }
 0x82b   : > { %1690 = vadd.xlane.f32.xlu0 %v1689_v56 }
 0x8b4   : > { %v1688_v61 = vpop.xlane.xlu0 %1687 }
 0x8b5   : > { %v1692_v63 = vmul.f32 0.03125, %v1688_v61 }
 0x8b7   : > { %v1694_v0 = vadd.f32 1e-05, %v1692_v63 }
 0x8b8   : > { %v1691_v1 = vpop.xlane.xlu0 %1690 }
 0x8b9   : > { %3694 = vrsqrt.f32 %v1694_v0  ;;  %v1693_v4 = vmul.f32 0.03125, %v1691_v1 }
 0x8bb   : > { %v1695_v6 = vadd.f32 1e-05, %v1693_v4 }
 0x8bd   : > { %3696 = vrsqrt.f32 %v1695_v6 }
 0x8c3   : > { %v3695_v7 = vpop.eup %3694 }
 0x8c4   : > { %v1698_v8 = vmul.f32 %v3695_v7, %v1682_v3 }
 0x8c6   : > { %v1707_v11 = vmul.f32 %v3156_v9, %v1698_v8  ;;  %v3642_v8 = vld [vmem:[%s4721_s5] sm:$0xff]  }
 0x8c7   : > { %v3697_v10 = vpop.eup %3696 }
 0x8c8   : > { %v1699_v12 = vmul.f32 %v3697_v10, %v1683_v53  ;;  %v1716_v15 = vadd.f32 %v3157_v13, %v1707_v11 }
 0x8ca   : > { %v1708_v14 = vmul.f32 %v3156_v9, %v1699_v12  ;;  %v3643_v9 = vld [vmem:[%s4721_s5 + $0x8] sm:$0xff]  }
 0x8cc   : > { %v1717_v16 = vadd.f32 %v3157_v13, %v1708_v14 }
 0x8ce   : > { %v1718_v17 = vpack.c.bf16 %v1717_v16, %v1716_v15 }
 0x8d0   : > { %3359 = vmatmul.mubr.msk.bf16.vlgmr.msra.gmra.mrb[16].mxu0 %vm957_vm0, %v1718_v17  ;;  %v3173_v17 = vld [vmem:[%s4722_s26] ss:$0 sm:$0xff]  ;;  %s4732_s26 = smov 8  }
 0x8d1   : > { %3386 = vmatprep.mubr.msk.bf16.mxu0 %vm3948_vm1, %v3947_v19  ;;  %3383 = vmatpush3.bf16.msra.mxu0 %v3642_v8 }
 0x8d2   : > { %3384 = vmatprep.subr.bf16.mxu0 %v3947_v19 }
 0x8d5   : > { %3385 = vmatpush3.bf16.msra.mxu0 %v3643_v9 }
 0x8d6   : > { %3390 = vmatprep.subr.bf16.mxu0 %v3947_v19 }
 0x9a3   : > { %v1779_v28 = vpop.f32.mrb[16].mxu0 }
 0x9a4   : > { %v1780_v29 = vadd.f32 %v3158_v27, %v1779_v28  ;;  %v3360_v30 = vpop.f32.mrb[17].mxu0  ;;  %v3175_v28 = vld [vmem:[%s4724_s28] ss:$0 sm:$0xff]  ;;  %s4730_s28 = smov 40  }
 0x9a5   : > { %v1782_v31 = vpop.f32.mrb[18].mxu0 }
 0x9a6   : > { %v3162_v32 = vmul.f32 -1.702, %v1780_v29  ;;  %v1783_v33 = vadd.f32 %v3158_v27, %v1782_v31  ;;  %v3361_v34 = vpop.f32.mrb[19].mxu0 }
 0x9a8   : > { %v1790_v35 = vmul.f32 1.442695, %v3162_v32  ;;  %v3163_v36 = vmul.f32 -1.702, %v1783_v33 }
 0x9aa   : > { %3698 = vpow2.f32 %v1790_v35  ;;  %v1792_v45 = vmul.f32 1.442695, %v3163_v36 }
 0x9ac   : > { %3700 = vpow2.f32 %v1792_v45 }
 0x9b4   : > { %v3699_v37 = vpop.eup %3698 }
 0x9b5   : > { %v1794_v38 = vadd.f32 1.0, %v3699_v37 }
 0x9b6   : > { %v3701_v39 = vpop.eup %3700 }
 0x9b7   : > { %3702 = vrcp.f32 %v1794_v38  ;;  %v1795_v40 = vadd.f32 1.0, %v3701_v39 }
 0x9b9   : > { %3704 = vrcp.f32 %v1795_v40 }
 0x9c1   : > { %v3703_v41 = vpop.eup %3702 }
 0x9c2   : > { %v1800_v44 = vmul.f32 %v3703_v41, %v1780_v29 }
 0x9c3   : > { %v3705_v43 = vpop.eup %3704 }
 0x9c4   : > { %v1801_v47 = vmul.f32 %v3705_v43, %v1783_v33 }
 0x9c6   : > { %v1802_v48 = vpack.c.bf16 %v1801_v47, %v1800_v44 }
 0x9c8   : > { %3379 = vmatmul.mubr.bf16.vlgmr.msra.gmra.mrb[24].mxu1 %v1802_v48 }
 0x9c9   : > { %3410 = vmatprep.mubr.msk.bf16.mxu1 %vm3948_vm1, %v3947_v19 }
 0xa9b   : > { %v1908_v50 = vpop.f32.mrb[24].mxu1 }
 0xa9c   : > { %v1909_v51 = vadd.f32 %v3164_v49, %v1908_v50  ;;  %v3380_v3 = vpop.f32.mrb[25].mxu1 }
 0xa9d   : > { %v1911_v52 = vpop.f32.mrb[26].mxu1 }
 0xa9e   : > { %v4437_v53 = vadd.f32 %v1909_v51, %v4395_v42  ;;  %v1912_v5 = vadd.f32 %v3164_v49, %v1911_v52  ;;  %v3381_v54 = vpop.f32.mrb[27].mxu1 }
 0xaa0   : > { %v4440_v55 = vadd.f32 %v1912_v5, %v4398_v46  ;;  %v1917_v56 = vsel %vm957_vm0, %v4437_v53, 0.0 }
 0xaa1   : > { %1918 = vadd.xlane.f32.xlu0 %v1917_v56 }
 0xaa2   : > { %v1920_v57 = vsel %vm957_vm0, %v4440_v55, 0.0 }
 0xaa3   : > { %1921 = vadd.xlane.f32.xlu1 %v1920_v57 }
 0xb2e   : > { %v1919_v59 = vpop.xlane.xlu0 %1918 }
 0xb2f   : > { %v1923_v61 = vmul.f32 0.03125, %v1919_v59 }
 0xb30   : > { %v1922_v63 = vpop.xlane.xlu1 %1921 }
 0xb31   : > { %v1925_v42 = vsub.f32 %v4437_v53, %v1923_v61  ;;  %v1924_v0 = vmul.f32 0.03125, %v1922_v63 }
 0xb33   : > { %v1926_v1 = vsub.f32 %v4440_v55, %v1924_v0  ;;  %v1927_v46 = vmul.f32 %v1925_v42, %v1925_v42 }
 0xb35   : > { %v1929_v4 = vsel %vm957_vm0, %v1927_v46, 0.0  ;;  %v1928_v6 = vmul.f32 %v1926_v1, %v1926_v1 }
 0xb36   : > { %1930 = vadd.xlane.f32.xlu0 %v1929_v4 }
 0xb37   : > { %v1932_v7 = vsel %vm957_vm0, %v1928_v6, 0.0 }
 0xb38   : > { %1933 = vadd.xlane.f32.xlu1 %v1932_v7 }
 0xbc3   : > { %v1931_v10 = vpop.xlane.xlu0 %1930 }
 0xbc4   : > { %v1935_v11 = vmul.f32 0.03125, %v1931_v10 }
 0xbc5   : > { %v1934_v12 = vpop.xlane.xlu1 %1933 }
 0xbc6   : > { %v1937_v13 = vadd.f32 1e-05, %v1935_v11  ;;  %v1936_v14 = vmul.f32 0.03125, %v1934_v12 }
 0xbc8   : > { %3706 = vrsqrt.f32 %v1937_v13  ;;  %v1938_v15 = vadd.f32 1e-05, %v1936_v14 }
 0xbca   : > { %3708 = vrsqrt.f32 %v1938_v15 }
 0xbd2   : > { %v3707_v16 = vpop.eup %3706 }
 0xbd3   : > { %v1941_v18 = vmul.f32 %v3707_v16, %v1925_v42 }
 0xbd4   : > { %v3709_v20 = vpop.eup %3708 }
 0xbd5   : > { %v1950_v21 = vmul.f32 %v3173_v17, %v1941_v18  ;;  %v1942_v22 = vmul.f32 %v3709_v20, %v1926_v1 }
 0xbd7   : > { %v1951_v24 = vmul.f32 %v3173_v17, %v1942_v22  ;;  %v1959_v25 = vadd.f32 %v3174_v23, %v1950_v21 }
 0xbd9   : > { %v1960_v26 = vadd.f32 %v3174_v23, %v1951_v24 }
 0xbdb   : > { %v1961_v27 = vpack.c.bf16 %v1960_v26, %v1959_v25 }
 0xbdd   : > { %3387 = vmatmul.mubr.msk.bf16.vlgmr.msra.gmra.mrb[20].mxu0 %vm957_vm0, %v1961_v27 }
 0xbde   : > { %3392 = vmatprep.mubr.msk.bf16.mxu0 %vm3948_vm1, %v3947_v19 }
 0xcb0   : > { %v2022_v29 = vpop.f32.mrb[20].mxu0 }
 0xcb1   : > { %v3388_v30 = vpop.f32.mrb[21].mxu0  ;;  %v2023_v32 = vadd.f32 %v3175_v28, %v2022_v29 }
 0xcb2   : > { %v2025_v31 = vpop.f32.mrb[22].mxu0 }
 0xcb3   : > { %v2026_v33 = vadd.f32 %v3175_v28, %v2025_v31  ;;  %v3389_v34 = vpop.f32.mrb[23].mxu0 }
 0xcb5   : > { %v4460_v35 = vpack.c.bf16 %v2026_v33, %v2023_v32 }
 0xcb7   : > { %2031 = vrot.lane.b32.xlu0 %v4460_v35, %s3950_s11  ;;  %s4726_s11 = smov 112  }
 0xcbb   : > { %2156 = vrot.lane.b32.xlu0 %v4460_v35, %s3949_s4  ;;  %s4725_s4 = smov 64  }
 0xcbf   : > { %2154 = vrot.lane.b32.xlu0 %v4460_v35, %s3951_s18  ;;  %s4727_s18 = smov 104  }
 0xcc3   : > { %2281 = vrot.lane.b32.xlu0 %v4460_v35, %s3953_s12  ;;  %s4728_s12 = smov 48  }
 0xcc7   : > { %2406 = vrot.lane.b32.xlu0 %v4460_v35, %s3955_s22  ;;  %s4729_s22 = smov 56  }
 0xd29   : > { %v2032_v36 = vpop.permute.xlu0 %2031 }
 0xd2a   : > { %v2037_v45 = vsel %vm1075_vm2, %v2032_v36, 0 }
 0xd2b   : > { %3391 = vmatpush3.bf16.xpose.msra.mxu0 %v2037_v45 }
 0xd2c   : > { %3396 = vmatprep.subr.bf16.mxu0 %v3947_v19 }
 0xd2d   : > { %v2157_v46 = vpop.permute.xlu0 %2156 }
 0xd2e   : > { %v2162_v10 = vsel %vm1075_vm2, %v2157_v46, 0 }
 0xd31   : > { %v2155_v9 = vpop.permute.xlu0 %2154 }
 0xd32   : > { %3393 = vmatmul.mubr.msk.bf16.vlgmr.msra.gmra.mrb[24].mxu0 %vm1075_vm2, %v4460_v35 }
 0xd33   : > { %3398 = vmatprep.mubr.msk.bf16.mxu0 %vm3948_vm1, %v3947_v19 }
 0xd35   : > { %v2282_v11 = vpop.permute.xlu0 %2281 }
 0xd36   : > { %v2287_v12 = vsel %vm1075_vm2, %v2282_v11, 0 }
 0xd39   : > { %v2407_v13 = vpop.permute.xlu0 %2406 }
 0xd3a   : > { %v2412_v15 = vsel %vm1075_vm2, %v2407_v13, 0 }
 0xe05   : > { %v2073_v37 = vpop.f32.mrb[24].mxu0 }
 0xe06   : > { %v2080_v38 = vmul.f32 0.35355338, %v2073_v37  ;;  %v3394_v39 = vpop.f32.mrb[25].mxu0 }
 0xe07   : > { %v2076_v40 = vpop.f32.mrb[26].mxu0 }
 0xe08   : > { %v2081_v41 = vmul.f32 0.35355338, %v2076_v40  ;;  %v3395_v43 = vpop.f32.mrb[27].mxu0  ;;  %v2082_v44 = vadd.f32 %v2080_v38, %v4325_v62 }
 0xe0a   : > { %v2084_v47 = vsel %vm1127_vm5, %v2082_v44, -inf  ;;  %v2083_v48 = vadd.f32 %v2081_v41, %v4328_v2 }
 0xe0b   : > { %2085 = vmax.xlane.f32.xlu1 %v2084_v47 }
 0xe0c   : > { %v2087_v49 = vsel %vm1127_vm5, %v2083_v48, -inf }
 0xe0f   : > { %2088 = vmax.xlane.f32.xlu1 %v2087_v49 }
 0xe98   : > { %v2086_v50 = vpop.xlane.xlu1 %2085 }
 0xe99   : > { %v2090_v51 = vsub.f32 %v2082_v44, %v2086_v50 }
 0xe9b   : > { %v2092_v3 = vmul.f32 1.442695, %v2090_v51 }
 0xe9c   : > { %v2089_v52 = vpop.xlane.xlu1 %2088 }
 0xe9d   : > { %3710 = vpow2.f32 %v2092_v3  ;;  %v2091_v5 = vsub.f32 %v2083_v48, %v2089_v52 }
 0xe9f   : > { %v2094_v54 = vmul.f32 1.442695, %v2091_v5 }
 0xea1   : > { %3712 = vpow2.f32 %v2094_v54 }
 0xea7   : > { %v3711_v56 = vpop.eup %3710 }
 0xea8   : > { %v2096_v57 = vsel %vm1127_vm5, %v3711_v56, 0.0 }
 0xea9   : > { %2097 = vadd.xlane.f32.xlu1 %v2096_v57 }
 0xeab   : > { %v3713_v59 = vpop.eup %3712 }
 0xeac   : > { %v2099_v61 = vsel %vm1127_vm5, %v3713_v59, 0.0 }
 0xead   : > { %2100 = vadd.xlane.f32.xlu1 %v2099_v61 }
 0xebe   : > { %2107 = vrot.lane.b32.xlu1 %v4460_v35, %s4725_s4  ;;  %s4733_s4 = smov 16  }
 0xec2   : > { %2279 = vrot.lane.b32.xlu1 %v4460_v35, %s4726_s11  ;;  %s4734_s11 = smov 24  }
 0xec6   : > { %2404 = vrot.lane.b32.xlu1 %v4460_v35, %s4727_s18  ;;  %s4735_s18 = sld [smem:[#allocation21_spill]] }
 0xf36   : > { %v2098_v63 = vpop.xlane.xlu1 %2097 }
 0xf37   : > { %3714 = vrcp.f32 %v2098_v63 }
 0xf3a   : > { %v2101_v42 = vpop.xlane.xlu1 %2100 }
 0xf3b   : > { %3716 = vrcp.f32 %v2101_v42 }
 0xf3e   : > { %v2108_v0 = vpop.permute.xlu1 %2107 }
 0xf3f   : > { %3397 = vmatpush3.bf16.msra.mxu0 %v2108_v0 }
 0xf40   : > { %3402 = vmatprep.subr.bf16.mxu0 %v3947_v19 }
 0xf41   : > { %v3715_v1 = vpop.eup %3714 }
 0xf42   : > { %v2104_v6 = vmul.f32 %v3715_v1, %v3711_v56  ;;  %v2280_v14 = vpop.permute.xlu1 %2279 }
 0xf45   : > { %v3717_v4 = vpop.eup %3716 }
 0xf46   : > { %v2105_v7 = vmul.f32 %v3717_v4, %v3713_v59  ;;  %v2405_v16 = vpop.permute.xlu1 %2404 }
 0xf48   : > { %v2106_v8 = vpack.c.bf16 %v2105_v7, %v2104_v6 }
 0xf4a   : > { %3399 = vmatmul.mubr.msk.bf16.vlgmr.msra.gmra.mrb[28].mxu0 %vm1127_vm5, %v2106_v8 }
 0xf4b   : > { %3403 = vmatpush3.bf16.xpose.msra.mxu0 %v2162_v10  ;;  %3404 = vmatprep.mubr.msk.bf16.mxu0 %vm3948_vm1, %v3947_v19 }
 0xf4c   : > { %3414 = vmatprep.subr.bf16.mxu0 %v3947_v19 }
 0xf52   : > { %3405 = vmatmul.mubr.msk.bf16.vlgmr.msra.gmra.mrb[32].mxu0 %vm1075_vm2, %v2155_v9 }
 0xf53   : > { %3415 = vmatpush3.bf16.xpose.msra.mxu0 %v2287_v12  ;;  %3416 = vmatprep.mubr.msk.bf16.mxu0 %vm3948_vm1, %v3947_v19 }
 0xf54   : > { %3426 = vmatprep.subr.bf16.mxu0 %v3947_v19 }
 0xf5a   : > { %3417 = vmatmul.mubr.msk.bf16.vlgmr.msra.gmra.mrb[36].mxu0 %vm1075_vm2, %v2280_v14 }
 0xf5b   : > { %3427 = vmatpush3.bf16.xpose.msra.mxu0 %v2412_v15  ;;  %3428 = vmatprep.mubr.msk.bf16.mxu0 %vm3948_vm1, %v3947_v19 }
 0xf5c   : > { %3438 = vmatprep.subr.bf16.mxu0 %v3947_v19 }
 0xf62   : > { %3429 = vmatmul.mubr.msk.bf16.vlgmr.msra.gmra.mrb[40].mxu0 %vm1075_vm2, %v2405_v16 }
 0xf63   : > { %3442 = vmatprep.mubr.msk.bf16.mxu0 %vm3948_vm1, %v3947_v19 }
0x101d   : > { %v4509_v17 = vpop.f32.mrb[28].mxu0 }
0x101e   : > { %v3400_v18 = vpop.f32.mrb[29].mxu0 }
0x101f   : > { %v4511_v20 = vpop.f32.mrb[30].mxu0 }
0x1020   : > { %v3401_v21 = vpop.f32.mrb[31].mxu0 }
0x1025   : > { %v2198_v22 = vpop.f32.mrb[32].mxu0 }
0x1026   : > { %v2205_v23 = vmul.f32 0.35355338, %v2198_v22  ;;  %v3406_v24 = vpop.f32.mrb[33].mxu0 }
0x1027   : > { %v2201_v25 = vpop.f32.mrb[34].mxu0 }
0x1028   : > { %v2206_v26 = vmul.f32 0.35355338, %v2201_v25  ;;  %v3407_v27 = vpop.f32.mrb[35].mxu0  ;;  %v2207_v28 = vadd.f32 %v2205_v23, %v4325_v62 }
0x102a   : > { %v2209_v29 = vsel %vm1127_vm5, %v2207_v28, -inf  ;;  %v2208_v30 = vadd.f32 %v2206_v26, %v4328_v2 }
0x102b   : > { %2210 = vmax.xlane.f32.xlu0 %v2209_v29 }
0x102c   : > { %v2212_v31 = vsel %vm1127_vm5, %v2208_v30, -inf }
0x102d   : > { %2213 = vmax.xlane.f32.xlu1 %v2212_v31  ;;  %v2323_v32 = vpop.f32.mrb[36].mxu0 }
0x102e   : > { %v2330_v33 = vmul.f32 0.35355338, %v2323_v32  ;;  %v3418_v34 = vpop.f32.mrb[37].mxu0 }
0x102f   : > { %v2326_v36 = vpop.f32.mrb[38].mxu0 }
0x1030   : > { %v2331_v45 = vmul.f32 0.35355338, %v2326_v36  ;;  %v3419_v37 = vpop.f32.mrb[39].mxu0  ;;  %v2332_v38 = vadd.f32 %v2330_v33, %v4325_v62 }
0x1032   : > { %v2334_v39 = vsel %vm1127_vm5, %v2332_v38, -inf  ;;  %v2333_v40 = vadd.f32 %v2331_v45, %v4328_v2 }
0x1033   : > { %2335 = vmax.xlane.f32.xlu0 %v2334_v39 }
0x1034   : > { %v2337_v47 = vsel %vm1127_vm5, %v2333_v40, -inf }
0x1035   : > { %v2448_v41 = vpop.f32.mrb[40].mxu0 }
0x1036   : > { %v2455_v43 = vmul.f32 0.35355338, %v2448_v41  ;;  %v3430_v44 = vpop.f32.mrb[41].mxu0 }
0x1037   : > { %2338 = vmax.xlane.f32.xlu0 %v2337_v47  ;;  %v2451_v48 = vpop.f32.mrb[42].mxu0 }
0x1038   : > { %v2456_v49 = vmul.f32 0.35355338, %v2451_v48  ;;  %v3431_v50 = vpop.f32.mrb[43].mxu0  ;;  %v2457_v51 = vadd.f32 %v2455_v43, %v4325_v62 }
0x103a   : > { %v2459_v3 = vsel %vm1127_vm5, %v2457_v51, -inf  ;;  %v2458_v52 = vadd.f32 %v2456_v49, %v4328_v2 }
0x103b   : > { %2460 = vmax.xlane.f32.xlu0 %v2459_v3 }
0x103c   : > { %v2462_v5 = vsel %vm1127_vm5, %v2458_v52, -inf }
0x103d   : > { %2463 = vmax.xlane.f32.xlu1 %v2462_v5 }
0x10b8   : > { %v2211_v54 = vpop.xlane.xlu0 %2210 }
0x10b9   : > { %v2215_v56 = vsub.f32 %v2207_v28, %v2211_v54  ;;  %v3644_v54 = vld [vmem:[%s4731_s7] sm:$0xff]  }
0x10ba   : > { %v2214_v57 = vpop.xlane.xlu1 %2213  ;;  %3439 = vmatpush3.bf16.msra.mxu0 %v3644_v54 }
0x10bb   : > { %v2217_v59 = vmul.f32 1.442695, %v2215_v56  ;;  %v2216_v61 = vsub.f32 %v2208_v30, %v2214_v57  ;;  %3440 = vmatprep.subr.bf16.mxu0 %v3947_v19 }
0x10bd   : > { %3718 = vpow2.f32 %v2217_v59  ;;  %v2219_v63 = vmul.f32 1.442695, %v2216_v61 }
0x10bf   : > { %3720 = vpow2.f32 %v2219_v63 }
0x10c0   : > { %v2336_v42 = vpop.xlane.xlu0 %2335 }
0x10c1   : > { %v2340_v0 = vsub.f32 %v2332_v38, %v2336_v42 }
0x10c3   : > { %v2342_v1 = vmul.f32 1.442695, %v2340_v0 }
0x10c4   : > { %v2339_v62 = vpop.xlane.xlu0 %2338 }
0x10c5   : > { %3722 = vpow2.f32 %v2342_v1  ;;  %v2341_v46 = vsub.f32 %v2333_v40, %v2339_v62  ;;  %v3645_v1 = vld [vmem:[%s4731_s7 + $0x8] sm:$0xff]  }
0x10c6   : > { %3441 = vmatpush3.bf16.msra.mxu0 %v3645_v1 }
0x10c7   : > { %v3719_v4 = vpop.eup %3718  ;;  %v2344_v2 = vmul.f32 1.442695, %v2341_v46  ;;  %3454 = vmatprep.subr.bf16.mxu0 %v3947_v19 }
0x10c8   : > { %v2461_v6 = vpop.xlane.xlu0 %2460  ;;  %v2221_v7 = vsel %vm1127_vm5, %v3719_v4, 0.0 }
0x10c9   : > { %v3721_v8 = vpop.eup %3720  ;;  %3724 = vpow2.f32 %v2344_v2  ;;  %v2465_v9 = vsub.f32 %v2457_v51, %v2461_v6  ;;  %2222 = vadd.xlane.f32.xlu0 %v2221_v7 }
0x10ca   : > { %v2224_v10 = vsel %vm1127_vm5, %v3721_v8, 0.0  ;;  %v2464_v21 = vpop.xlane.xlu1 %2463 }
0x10cb   : > { %v2467_v11 = vmul.f32 1.442695, %v2465_v9  ;;  %2225 = vadd.xlane.f32.xlu1 %v2224_v10  ;;  %v2466_v22 = vsub.f32 %v2458_v52, %v2464_v21 }
0x10cd   : > { %3726 = vpow2.f32 %v2467_v11  ;;  %v2469_v23 = vmul.f32 1.442695, %v2466_v22 }
0x10cf   : > { %v3723_v12 = vpop.eup %3722  ;;  %3728 = vpow2.f32 %v2469_v23 }
0x10d0   : > { %v2346_v13 = vsel %vm1127_vm5, %v3723_v12, 0.0 }
0x10d1   : > { %2347 = vadd.xlane.f32.xlu0 %v2346_v13 }
0x10d3   : > { %v3725_v14 = vpop.eup %3724 }
0x10d4   : > { %v2349_v15 = vsel %vm1127_vm5, %v3725_v14, 0.0 }
0x10d5   : > { %2350 = vadd.xlane.f32.xlu1 %v2349_v15 }
0x10d7   : > { %v3727_v16 = vpop.eup %3726 }
0x10d8   : > { %v2471_v18 = vsel %vm1127_vm5, %v3727_v16, 0.0 }
0x10d9   : > { %2472 = vadd.xlane.f32.xlu0 %v2471_v18  ;;  %v3729_v24 = vpop.eup %3728 }
0x10da   : > { %v2474_v25 = vsel %vm1127_vm5, %v3729_v24, 0.0 }
0x10e6   : > { %2357 = vrot.lane.b32.xlu1 %v4460_v35, %s4728_s12  ;;  %s4736_s12 = sld [smem:[#allocation24_spill]] }
0x10ef   : > { %2232 = vrot.lane.b32.xlu0 %v4460_v35, %s4729_s22  ;;  %s4737_s22 = sld [smem:[#allocation22_spill]] }
0x10f5   : > { %v3191_v54 = vld [vmem:[%s4737_s22] ss:$0 sm:$0xff]  ;;  %s934_s22 = sand.u32 1, %s3904_s15  }
0x110a   : > { %2475 = vadd.xlane.f32.xlu1 %v2474_v25 }
0x111b   : > { %2482 = vrot.lane.b32.xlu1 %v4460_v35, %s4730_s28  ;;  %s4738_s28 = sld [smem:[#allocation23_spill]] }
0x1156   : > { %v2223_v27 = vpop.xlane.xlu0 %2222 }
0x1158   : > { %v2226_v26 = vpop.xlane.xlu1 %2225 }
0x1159   : > { %3730 = vrcp.f32 %v2226_v26 }
0x115a   : > { %3732 = vrcp.f32 %v2223_v27 }
0x115e   : > { %v2348_v28 = vpop.xlane.xlu0 %2347 }
0x1162   : > { %v2351_v29 = vpop.xlane.xlu1 %2350 }
0x1163   : > { %3734 = vrcp.f32 %v2351_v29  ;;  %v3731_v30 = vpop.eup %3730 }
0x1164   : > { %3736 = vrcp.f32 %v2348_v28  ;;  %v3733_v32 = vpop.eup %3732  ;;  %v2230_v33 = vmul.f32 %v3731_v30, %v3721_v8 }
0x1165   : > { %v2229_v34 = vmul.f32 %v3733_v32, %v3719_v4 }
0x1166   : > { %v2473_v31 = vpop.xlane.xlu0 %2472  ;;  %v2358_v35 = vpop.permute.xlu1 %2357 }
0x1167   : > { %v2231_v45 = vpack.c.bf16 %v2230_v33, %v2229_v34  ;;  %3738 = vrcp.f32 %v2473_v31 }
0x116a   : > { %v2233_v36 = vpop.permute.xlu0 %2232 }
0x116b   : > { %3409 = vmatpush3.bf16.msra.mxu1 %v2233_v36 }
0x116c   : > { %3420 = vmatprep.subr.bf16.mxu1 %v3947_v19 }
0x116d   : > { %v3735_v37 = vpop.eup %3734 }
0x116e   : > { %3411 = vmatmul.mubr.msk.bf16.vlgmr.msra.gmra.mrb[28].mxu1 %vm1127_vm5, %v2231_v45  ;;  %v3737_v38 = vpop.eup %3736  ;;  %v2355_v39 = vmul.f32 %v3735_v37, %v3725_v14 }
0x116f   : > { %3421 = vmatpush3.bf16.msra.mxu1 %v2358_v35  ;;  %3422 = vmatprep.mubr.msk.bf16.mxu1 %vm3948_vm1, %v3947_v19  ;;  %v2354_v40 = vmul.f32 %v3737_v38, %v3723_v12 }
0x1170   : > { %3432 = vmatprep.subr.bf16.mxu1 %v3947_v19 }
0x1171   : > { %v2356_v41 = vpack.c.bf16 %v2355_v39, %v2354_v40  ;;  %v3739_v47 = vpop.eup %3738 }
0x1172   : > { %v2479_v49 = vmul.f32 %v3739_v47, %v3727_v16 }
0x1176   : > { %3423 = vmatmul.mubr.msk.bf16.vlgmr.msra.gmra.mrb[32].mxu1 %vm1127_vm5, %v2356_v41 }
0x1177   : > { %3434 = vmatprep.mubr.msk.bf16.mxu1 %vm3948_vm1, %v3947_v19 }
0x1197   : > { %v2476_v43 = vpop.xlane.xlu1 %2475 }
0x1198   : > { %3740 = vrcp.f32 %v2476_v43  ;;  %v3646_v43 = vld [vmem:[%s4736_s12] sm:$0xff]  }
0x119b   : > { %v2483_v44 = vpop.permute.xlu1 %2482 }
0x119c   : > { %3433 = vmatpush3.bf16.msra.mxu1 %v2483_v44  ;;  %v3647_v44 = vld [vmem:[%s4736_s12 + $0x8] sm:$0xff]  }
0x119d   : > { %3446 = vmatprep.subr.bf16.mxu1 %v3947_v19 }
0x11a2   : > { %v3741_v48 = vpop.eup %3740 }
0x11a3   : > { %v2480_v50 = vmul.f32 %v3741_v48, %v3729_v24 }
0x11a5   : > { %v2481_v51 = vpack.c.bf16 %v2480_v50, %v2479_v49 }
0x11a7   : > { %3435 = vmatmul.mubr.msk.bf16.vlgmr.msra.gmra.mrb[36].mxu1 %vm1127_vm5, %v2481_v51 }
0x11a8   : > { %3450 = vmatprep.mubr.msk.bf16.mxu1 %vm3948_vm1, %v3947_v19  ;;  %3447 = vmatpush3.bf16.msra.mxu1 %v3646_v43 }
0x11a9   : > { %3448 = vmatprep.subr.bf16.mxu1 %v3947_v19 }
0x11ac   : > { %3449 = vmatpush3.bf16.msra.mxu1 %v3647_v44 }
0x11ad   : > { %3474 = vmatprep.subr.bf16.mxu1 %v3947_v19 }
0x1241   : > { %v2272_v3 = vpop.f32.mrb[28].mxu1 }
0x1242   : > { %v3412_v52 = vpop.f32.mrb[29].mxu1 }
0x1243   : > { %v2275_v5 = vpop.f32.mrb[30].mxu1 }
0x1244   : > { %v3613_v56 = vpack.i.bf16 %v2275_v5, %v2272_v3  ;;  %v3413_v57 = vpop.f32.mrb[31].mxu1 }
0x1246   : > { %3614 = vrot.lane.b32.xlu1 %v3613_v56, %s4732_s26  ;;  %s4739_s26 = sld [smem:[#allocation26_spill]] }
0x1249   : > { %v2397_v59 = vpop.f32.mrb[32].mxu1 }
0x124a   : > { %v3424_v61 = vpop.f32.mrb[33].mxu1 }
0x124b   : > { %v2400_v63 = vpop.f32.mrb[34].mxu1  ;;  %v3192_v61 = vld [vmem:[%s4738_s28] ss:$0 sm:$0xff]  ;;  %s3215_s28 = sshll.u32 %s4146_s0, 4  ;;  %s3963_s0 = smov [#allocation10]  }
0x124c   : > { %v3618_v42 = vpack.i.bf16 %v2400_v63, %v2397_v59  ;;  %v3425_v0 = vpop.f32.mrb[35].mxu1  ;;  %s3846_s5 = sshll.u32 %s3963_s0, 4  ;;  %s3847_s5 = int_to_ptr.vmem [resolvable:$false] %s3846_s5 }
0x124e   : > { %3619 = vrot.lane.b32.xlu0 %v3618_v42, %s4733_s4  ;;  %s4740_s4 = sld [smem:[#allocation25_spill]] }
0x127a   : > { %v2522_v62 = vpop.f32.mrb[36].mxu1 }
0x127b   : > { %v3436_v46 = vpop.f32.mrb[37].mxu1 }
0x127c   : > { %v2525_v4 = vpop.f32.mrb[38].mxu1  ;;  %v3649_v46 = vld [vmem:[%s4739_s26 + $0x8] sm:$0xff]  }
0x127d   : > { %v3623_v2 = vpack.i.bf16 %v2525_v4, %v2522_v62  ;;  %v3437_v6 = vpop.f32.mrb[39].mxu1  ;;  %v3648_v62 = vld [vmem:[%s4739_s26] sm:$0xff]   ;;  %v3650_v4 = vld [vmem:[%s4739_s26 + $0x10] sm:$0xff]  }
0x127e   : > { %v3652_v6 = vld [vmem:[%s4739_s26 + $0x20] sm:$0xff]  }
0x127f   : > { %3624 = vrot.lane.b32.xlu1 %v3623_v2, %s4734_s11  ;;  %v3651_v2 = vld [vmem:[%s4739_s26 + $0x18] sm:$0xff]   ;;  %s4741_s11 = sld [smem:[#allocation27_spill]] }
0x12b8   : > { %v3615_v7 = vpop.permute.xlu1 %3614 }
0x12b9   : > { %v3617_v9 = vunpack.i.h.bf16 %v3615_v7  ;;  %v3616_v10 = vunpack.i.l.bf16 %v3615_v7  ;;  %v3653_v7 = vld [vmem:[%s4739_s26 + $0x28] sm:$0xff]  }
0x12bb   : > { %v2554_v14 = vsel %vm1075_vm2, %v4511_v20, %v3617_v9  ;;  %v2553_v15 = vsel %vm1075_vm2, %v4509_v17, %v3616_v10  ;;  %v3187_v20 = vld [vmem:[%s4735_s18] ss:$0 sm:$0xff]  ;;  %v3655_v9 = vld [vmem:[%s4739_s26 + $0x38] sm:$0xff]   ;;  %s2916_s18 = sld [smem:[#allocation3]] }
0x12bc   : > { %v3193_v10 = vld [vmem:[%s4740_s4] ss:$0 sm:$0xff]  ;;  %s935_s4 = scalar_lea.vmem [#allocation10], %s934_s22 }
0x12c0   : > { %v3620_v8 = vpop.permute.xlu0 %3619 }
0x12c1   : > { %v3622_v11 = vunpack.i.h.bf16 %v3620_v8  ;;  %v3621_v12 = vunpack.i.l.bf16 %v3620_v8  ;;  %v3654_v8 = vld [vmem:[%s4739_s26 + $0x30] sm:$0xff]  }
0x12c3   : > { %v2556_v21 = vsel %vm1127_vm5, %v2554_v14, %v3622_v11  ;;  %v2555_v22 = vsel %vm1127_vm5, %v2553_v15, %v3621_v12 }
0x12f1   : > { %v3625_v13 = vpop.permute.xlu1 %3624 }
0x12f2   : > { %v3627_v16 = vunpack.i.h.bf16 %v3625_v13  ;;  %v3626_v18 = vunpack.i.l.bf16 %v3625_v13 }
0x12f4   : > { %v2558_v23 = vsel %vm1601_vm6, %v2556_v21, %v3627_v16  ;;  %v2557_v24 = vsel %vm1601_vm6, %v2555_v22, %v3626_v18 }
0x12f5   : > { %v2559_v25 = vpack.c.bf16 %v2558_v23, %v2557_v24 }
0x12f7   : > { %3443 = vmatmul.mubr.msk.bf16.vlgmr.msra.gmra.mrb[44].mxu0 %vm957_vm0, %v2559_v25 }
0x12f8   : > { %3470 = vmatprep.mubr.msk.bf16.mxu0 %vm3948_vm1, %v3947_v19  ;;  %3455 = vmatpush3.bf16.msra.mxu0 %v3648_v62 }
0x12f9   : > { %3456 = vmatprep.subr.bf16.mxu0 %v3947_v19 }
0x12fc   : > { %3457 = vmatpush3.bf16.msra.mxu0 %v3649_v46  ;;  %v3209_v46 = vld [vmem:[%s4742_s1] ss:$0 sm:$0xff]  ;;  %s2998_s1 = scalar_lea.sflag [#allocation6], %s934_s22 }
0x12fd   : > { %3458 = vmatprep.subr.bf16.mxu0 %v3947_v19 }
0x1300   : > { %3459 = vmatpush3.bf16.msra.mxu0 %v3650_v4 }
0x1301   : > { %3460 = vmatprep.subr.bf16.mxu0 %v3947_v19 }
0x1304   : > { %3461 = vmatpush3.bf16.msra.mxu0 %v3651_v2 }
0x1305   : > { %3462 = vmatprep.subr.bf16.mxu0 %v3947_v19 }
0x1308   : > { %3463 = vmatpush3.bf16.msra.mxu0 %v3652_v6 }
0x1309   : > { %3464 = vmatprep.subr.bf16.mxu0 %v3947_v19 }
0x130c   : > { %3465 = vmatpush3.bf16.msra.mxu0 %v3653_v7 }
0x130d   : > { %3466 = vmatprep.subr.bf16.mxu0 %v3947_v19 }
0x1310   : > { %3467 = vmatpush3.bf16.msra.mxu0 %v3654_v8 }
0x1311   : > { %3468 = vmatprep.subr.bf16.mxu0 %v3947_v19 }
0x1314   : > { %3469 = vmatpush3.bf16.msra.mxu0 %v3655_v9 }
0x13ca   : > { %v2620_v26 = vpop.f32.mrb[44].mxu0 }
0x13cb   : > { %v2621_v27 = vadd.f32 %v3187_v20, %v2620_v26  ;;  %v3444_v17 = vpop.f32.mrb[45].mxu0 }
0x13cc   : > { %v2623_v28 = vpop.f32.mrb[46].mxu0 }
0x13cd   : > { %v4569_v29 = vadd.f32 %v2621_v27, %v4437_v53  ;;  %v2624_v30 = vadd.f32 %v3187_v20, %v2623_v28  ;;  %v3445_v31 = vpop.f32.mrb[47].mxu0 }
0x13cf   : > { %v4572_v32 = vadd.f32 %v2624_v30, %v4440_v55  ;;  %v2629_v33 = vsel %vm957_vm0, %v4569_v29, 0.0 }
0x13d0   : > { %2630 = vadd.xlane.f32.xlu0 %v2629_v33  ;;  %v3199_v33 = vld [vmem:[%s4741_s11] ss:$0 sm:$0xff]  ;;  %s3010_s11 = sshll.u32 %s935_s4, 4  ;;  %s4631_s11 = int_to_ptr.vmem [resolvable:$true] %s3010_s11 }
0x13d1   : > { %v2632_v34 = vsel %vm957_vm0, %v4572_v32, 0.0  ;;  %s3842_s3 = scalar_lea.vmem %s4631_s11, 16  ;;  %p3849_p10 = scmp.lt.s32.totalorder %s4631_s11, %s3847_s5 }
0x13d2   : > { %2633 = vadd.xlane.f32.xlu1 %v2632_v34  ;;  %p3843_p4 = scmp.ne.s32.totalorder %s4631_s11, %s3842_s3 }
0x13d4   : > { %p3844_p6 = pnand %p3843_p4, %p4743_p5 }
0x13d6   : > { %p3845_p9 = pneg %p3844_p6 }
0x145d   : > { %v2631_v36 = vpop.xlane.xlu0 %2630 }
0x145e   : > { %v2635_v45 = vmul.f32 0.03125, %v2631_v36 }
0x145f   : > { %v2634_v37 = vpop.xlane.xlu1 %2633 }
0x1460   : > { %v2637_v53 = vsub.f32 %v4569_v29, %v2635_v45  ;;  %v2636_v35 = vmul.f32 0.03125, %v2634_v37 }
0x1462   : > { %v2638_v38 = vsub.f32 %v4572_v32, %v2636_v35  ;;  %v2639_v55 = vmul.f32 %v2637_v53, %v2637_v53 }
0x1464   : > { %v2641_v39 = vsel %vm957_vm0, %v2639_v55, 0.0  ;;  %v2640_v40 = vmul.f32 %v2638_v38, %v2638_v38 }
0x1465   : > { %2642 = vadd.xlane.f32.xlu0 %v2641_v39 }
0x1466   : > { %v2644_v41 = vsel %vm957_vm0, %v2640_v40, 0.0 }
0x1469   : > { %2645 = vadd.xlane.f32.xlu0 %v2644_v41 }
0x14f2   : > { %v2643_v47 = vpop.xlane.xlu0 %2642 }
0x14f3   : > { %v2647_v48 = vmul.f32 0.03125, %v2643_v47 }
0x14f5   : > { %v2649_v49 = vadd.f32 1e-05, %v2647_v48 }
0x14f6   : > { %v2646_v50 = vpop.xlane.xlu0 %2645 }
0x14f7   : > { %3742 = vrsqrt.f32 %v2649_v49  ;;  %v2648_v51 = vmul.f32 0.03125, %v2646_v50 }
0x14f9   : > { %v2650_v3 = vadd.f32 1e-05, %v2648_v51 }
0x14fb   : > { %3744 = vrsqrt.f32 %v2650_v3 }
0x1501   : > { %v3743_v52 = vpop.eup %3742 }
0x1502   : > { %v2653_v5 = vmul.f32 %v3743_v52, %v2637_v53  ;;  %v3657_v52 = vld [vmem:[%s4117_s10 + $0x8] sm:$0xff]  }
0x1504   : > { %v2662_v57 = vmul.f32 %v3191_v54, %v2653_v5 }
0x1505   : > { %v3745_v56 = vpop.eup %3744 }
0x1506   : > { %v2654_v59 = vmul.f32 %v3745_v56, %v2638_v38  ;;  %v2671_v42 = vadd.f32 %v3192_v61, %v2662_v57 }
0x1508   : > { %v2663_v63 = vmul.f32 %v3191_v54, %v2654_v59 }
0x150a   : > { %v2672_v0 = vadd.f32 %v3192_v61, %v2663_v63  ;;  %v2917_v63 = vstv %s2916_s18  ;;  %s4629_s18 = scalar_lea.hbm %s4122_s16, %s3215_s28  ;;  %s3848_s28 = scalar_lea.vmem %s3847_s5, 32 }
0x150b   : > { %vm2918_vm7 = vcmp.eq.s32.totalorder %v4317_v58, %v2917_v63  ;;  %vm2919_vm8 = vcmp.eq.s32.totalorder %v4320_v60, %v2917_v63  ;;  %p3850_p7 = scmp.lt.s32.totalorder %s3848_s28, %s3842_s3 }
0x150c   : > { %v2673_v1 = vpack.c.bf16 %v2672_v0, %v2671_v42  ;;  %v3208_v0 = vld [vmem:[%s4107_s20] ss:$0 sm:$0xff]  ;;  %v3210_v6 = vsel %vm2918_vm7, 1.0, %v3947_v19  ;;  %v3211_v9 = vsel %vm2919_vm8, 1.0, %v3947_v19 }
0x150d   : > { %p3851_p8 = por %p3850_p7, %p3849_p10 }
0x150e   : > { %3451 = vmatmul.mubr.msk.bf16.vlgmr.msra.gmra.mrb[40].mxu1 %vm957_vm0, %v2673_v1 }
0x150f   : > { %3478 = vmatprep.mubr.msk.bf16.mxu1 %vm3948_vm1, %v3947_v19  ;;  %p3852_p11 = pnand %p3851_p8, %p3845_p9 }
0x15e1   : > { %v2734_v11 = vpop.f32.mrb[40].mxu1 }
0x15e2   : > { %v2735_v12 = vadd.f32 %v3193_v10, %v2734_v11  ;;  %v3452_v13 = vpop.f32.mrb[41].mxu1 }
0x15e3   : > { %v2737_v14 = vpop.f32.mrb[42].mxu1 }
0x15e4   : > { %v3197_v15 = vmul.f32 -1.702, %v2735_v12  ;;  %v2738_v16 = vadd.f32 %v3193_v10, %v2737_v14  ;;  %v3453_v18 = vpop.f32.mrb[43].mxu1 }
0x15e6   : > { %v2745_v21 = vmul.f32 1.442695, %v3197_v15  ;;  %v3198_v22 = vmul.f32 -1.702, %v2738_v16 }
0x15e8   : > { %3746 = vpow2.f32 %v2745_v21  ;;  %v2747_v23 = vmul.f32 1.442695, %v3198_v22 }
0x15ea   : > { %3748 = vpow2.f32 %v2747_v23 }
0x15f2   : > { %v3747_v24 = vpop.eup %3746 }
0x15f3   : > { %v2749_v25 = vadd.f32 1.0, %v3747_v24 }
0x15f4   : > { %v3749_v20 = vpop.eup %3748 }
0x15f5   : > { %3750 = vrcp.f32 %v2749_v25  ;;  %v2750_v26 = vadd.f32 1.0, %v3749_v20 }
0x15f7   : > { %3752 = vrcp.f32 %v2750_v26 }
0x15ff   : > { %v3751_v27 = vpop.eup %3750 }
0x1600   : > { %v2755_v28 = vmul.f32 %v3751_v27, %v2735_v12 }
0x1601   : > { %v3753_v17 = vpop.eup %3752 }
0x1602   : > { %v2756_v30 = vmul.f32 %v3753_v17, %v2738_v16 }
0x1604   : > { %v2757_v31 = vpack.c.bf16 %v2756_v30, %v2755_v28 }
0x1606   : > { %3471 = vmatmul.mubr.bf16.vlgmr.msra.gmra.mrb[48].mxu0 %v2757_v31 }
0x16d9   : > { %v2863_v34 = vpop.f32.mrb[48].mxu0 }
0x16da   : > { %v2864_v36 = vadd.f32 %v3199_v33, %v2863_v34  ;;  %v3472_v45 = vpop.f32.mrb[49].mxu0 }
0x16db   : > { %v2866_v37 = vpop.f32.mrb[50].mxu0 }
0x16dc   : > { %v2867_v53 = vadd.f32 %v3199_v33, %v2866_v37  ;;  %v3473_v35 = vpop.f32.mrb[51].mxu0  ;;  %v2870_v38 = vadd.f32 %v2864_v36, %v4569_v29 }
0x16de   : > { %v2872_v55 = vsel %vm957_vm0, %v2870_v38, 0.0  ;;  %v2871_v39 = vadd.f32 %v2867_v53, %v4572_v32  ;;  %v3656_v32 = vld [vmem:[%s4117_s10] sm:$0xff]  }
0x16df   : > { %2873 = vadd.xlane.f32.xlu0 %v2872_v55  ;;  %3475 = vmatpush3.bf16.msra.mxu1 %v3656_v32 }
0x16e0   : > { %v2875_v40 = vsel %vm957_vm0, %v2871_v39, 0.0  ;;  %3476 = vmatprep.subr.bf16.mxu1 %v3947_v19 }
0x16e1   : > { %2876 = vadd.xlane.f32.xlu1 %v2875_v40 }
0x16e3   : > { %3477 = vmatpush3.bf16.msra.mxu1 %v3657_v52 }
0x176c   : > { %v2874_v41 = vpop.xlane.xlu0 %2873 }
0x176d   : > { %v2878_v43 = vmul.f32 0.03125, %v2874_v41 }
0x176e   : > { %v2877_v44 = vpop.xlane.xlu1 %2876 }
0x176f   : > { %v2880_v47 = vsub.f32 %v2870_v38, %v2878_v43  ;;  %v2879_v48 = vmul.f32 0.03125, %v2877_v44 }
0x1771   : > { %v2881_v49 = vsub.f32 %v2871_v39, %v2879_v48  ;;  %v2882_v50 = vmul.f32 %v2880_v47, %v2880_v47 }
0x1773   : > { %v2884_v51 = vsel %vm957_vm0, %v2882_v50, 0.0  ;;  %v2883_v29 = vmul.f32 %v2881_v49, %v2881_v49 }
0x1774   : > { %2885 = vadd.xlane.f32.xlu0 %v2884_v51 }
0x1775   : > { %v2887_v3 = vsel %vm957_vm0, %v2883_v29, 0.0 }
0x1776   : > { %2888 = vadd.xlane.f32.xlu1 %v2887_v3 }
0x1801   : > { %v2886_v5 = vpop.xlane.xlu0 %2885 }
0x1802   : > { %v2890_v54 = vmul.f32 0.03125, %v2886_v5 }
0x1803   : > { %v2889_v56 = vpop.xlane.xlu1 %2888 }
0x1804   : > { %v2892_v57 = vadd.f32 1e-05, %v2890_v54  ;;  %v2891_v59 = vmul.f32 0.03125, %v2889_v56 }
0x1806   : > { %3754 = vrsqrt.f32 %v2892_v57  ;;  %v2893_v61 = vadd.f32 1e-05, %v2891_v59 }
0x1808   : > { %3756 = vrsqrt.f32 %v2893_v61 }
0x1810   : > { %v3755_v42 = vpop.eup %3754 }
0x1811   : > { %v2896_v1 = vmul.f32 %v3755_v42, %v2880_v47 }
0x1812   : > { %v3757_v62 = vpop.eup %3756 }
0x1813   : > { %v2905_v4 = vmul.f32 %v3208_v0, %v2896_v1  ;;  %v2897_v2 = vmul.f32 %v3757_v62, %v2881_v49 }
0x1815   : > { %v2914_v7 = vadd.f32 %v3209_v46, %v2905_v4  ;;  %v2906_v8 = vmul.f32 %v3208_v0, %v2897_v2 }
0x1817   : > { %v2924_v10 = vmul.f32 %v3210_v6, %v2914_v7  ;;  %v2915_v11 = vadd.f32 %v3209_v46, %v2906_v8 }
0x1819   : > { %v2925_v12 = vmul.f32 %v3211_v9, %v2915_v11  ;;  %v2926_v58 = vsel %vm957_vm0, %v2924_v10, 0.0 }
0x181b   : > { %v2927_v13 = vsel %vm957_vm0, %v2925_v12, 0.0 }
0x181c   : > { %v2928_v14 = vadd.f32 %v2927_v13, %v2926_v58 }
0x181e   : > { %v2929_v15 = vrot.slane %v2928_v14, 4 }
0x1820   : > { %v2930_v60 = vadd.f32 %v2929_v15, %v2928_v14 }
0x1822   : > { %v2931_v16 = vrot.slane %v2930_v60, 2 }
0x1824   : > { %v2932_v18 = vadd.f32 %v2931_v16, %v2930_v60 }
0x1826   : > { %v2933_v21 = vrot.slane %v2932_v18, 1 }
0x1828   : > { %v2934_v22 = vadd.f32 %v2933_v21, %v2932_v18 }
0x182a   : > { %v2935_v23 = vpack.c.bf16 %v2934_v22, %v2934_v22 }
0x182c   : > { %3479 = vmatmul.mubr.msk.bf16.vlgmr.msra.gmra.mrb[44].mxu1 %vm957_vm0, %v2935_v23 }
0x18ff   : > { %v2989_v19 = vpop.f32.mrb[44].mxu1 }
0x1900   : > { %2996 = vst.msk [vmem:[%s935_s4] sm:$0x1] %vm2995_vm9, %v2989_v19  ;;  %v3480_v24 = vpop.f32.mrb[45].mxu1 }
0x1901   : > { %v2992_v25 = vpop.f32.mrb[46].mxu1 }
0x1902   : > { %3855 = shalt.err (!%p3852_p11)
}
0x1903   : > { %s3856_s22 = scalar_lea.hbm %s4629_s18, 16  ;;  %s3860_s4 = scalar_lea.hbm %s4122_s16, 32 }
0x1904   : > { %p3857_p13 = scmp.ne.s32.totalorder %s4629_s18, %s3856_s22  ;;  %p3861_p2 = scmp.lt.u32.totalorder %s4629_s18, %s4122_s16 }
0x1905   : > { %p3862_p3 = scmp.lt.u32.totalorder %s3860_s4, %s3856_s22  ;;  %p3864_p4 = scmp.lt.u32.totalorder %s3856_s22, %s4629_s18 }
0x1906   : > { %p3858_p1 = pnand %p3857_p13, %p4743_p5 }
0x1907   : > { %p3863_p12 = por %p3862_p3, %p3861_p2 }
0x1908   : > { %p3859_p0 = pneg %p3858_p1 }
0x1909   : > { %p3865_p6 = por %p3864_p4, %p3863_p12 }
0x190b   : > { %p3866_p9 = pnand %p3865_p6, %p3859_p0 }
0x190d   : > { %3869 = shalt.err (!%p3866_p9)
}
0x190e   : > { %3494 = dma.vmem_to_hbm [thread:$0]  (%p4743_p5), %s4631_s11, 16, %s4629_s18, %s2998_s1   ;;  %v3481_v20 = vpop.f32.mrb[47].mxu1 }
0x190f PF: > { %s4744_s3 = sld [smem:[#allocation32_spill]]  ;;  %p3516_p10 = scmp.ge.s32.totalorder %s3912_s27, 2 }
0x1910   : > { %s3022_s5 = sand.u32 1, %s3900_s23  }
0x1911   : > { %s3023_s0 = scalar_lea.sflag [#allocation6], %s3022_s5 }
0x1915   : > { %p4745_p7 = scmp.ne.s32.totalorder %s4744_s3, 0 }
0x1917   : > { %p3507_p8 = pnand %p3516_p10, %p4745_p7 }
0x1919   : > { %3895 = dma.done.wait (!%p3507_p8), %s3023_s0, 16  }
0x191a   : > { %3897 = vsyncadd (!%p3507_p8), %s3023_s0, 4294967280  ;;  %s4746_s27 = sld [smem:[#allocation30_spill]]  ;;  %s4747_s28 = sld [smem:[#allocation29_spill]] }
0x191b   : > { %s4748_s18 = sld [smem:[#allocation31_spill]]  ;;  %s4749_s23 = smov %s3904_s15 }
0x1920   : > { %p74_p11 = scmp.ge.s32.totalorder %s4746_s27, 4   ;;  %s4750_s15 = smov %s4747_s28 }
0x1922   :  { %76 = sbr.rel (!%p74_p11) target bundleno = 55 (0x37), region = 214 }
0x1929   :  { %3027 = vsyncpa [#allocation5], 1 }
0x192a   :  { %3029 = vsyncpa [#allocation5 + $0x1], 1 }
0x192b   :  { %3030 = vsyncpa [#allocation8], 1 }
0x192c   :  { %3031 = vsyncpa [#allocation6], 1 }
0x192d   :  { %3033 = vsyncpa [#allocation6 + $0x1], 1 }

</bundles_post_ra>
